<compile_context>
chip_gen: v5e
topology: v5e:2x2
jax: 0.10.0
libtpu: 0.0.40
codegen_flags: <defaults>
</compile_context>

<pallas_src>
import functools
import math

import jax
import jax.numpy as jnp
from jax import lax
from jax.experimental import pallas as pl
from jax.experimental.pallas import tpu as pltpu


# ----------------------------- in-kernel helpers -----------------------------

def _dot(a, b):
    return jnp.dot(a, b, preferred_element_type=jnp.float32)


def _dot_t(a, b):
    # a @ b.T without materializing the transpose (NT matmul on the MXU).
    return lax.dot_general(a, b, (((1,), (1,)), ((), ())),
                           preferred_element_type=jnp.float32)


def _layernorm(x, gamma, beta, eps=1e-5):
    mean = jnp.mean(x, axis=-1, keepdims=True)
    var = jnp.mean((x - mean) ** 2, axis=-1, keepdims=True)
    return (x - mean) * lax.rsqrt(var + eps) * gamma + beta


# ----------------------------- fused forward kernel --------------------------

def _fused_kernel(B, C, num_classes,
                  x_ref, block_ref, wide_ref, sq_ref, vec_ref, w1_ref,
                  out_ref, flat_ref):
    """Entire HN_DGTS forward for the whole (batch-folded) input.

    x_ref:     (B*C, D)          all batch rows stacked
    block_ref: (B*C, B*C)        1.0 where rows belong to the same sample
    wide_ref:  (D, 4D+4H)        [dgc_w1 | tsa_q | tsa_k | tsa_v | c1_kv | c2_kv]
    sq_ref:    (9, H, H)         square weights, indexed by leading dim
    vec_ref:   (18+NC, 128)      biases, LN params, clf_b1, clf_b2, clf_w2^T
    w1_ref:    (C*H, 128)        classifier first linear (Flatten folded in)
    flat_ref:  (B, C*H) scratch  per-sample flattened features
    """
    X = x_ref[...]                                        # (BC, D)
    BC, D = X.shape
    H = D

    wide = wide_ref[...]
    vec = vec_ref[...]
    block_f = block_ref[...]                              # (BC, BC) same-sample mask
    neg_mask = (1.0 - block_f) * (-1e30)                  # additive softmax mask

    ri = lax.broadcasted_iota(jnp.int32, (BC, BC), 0)
    ci = lax.broadcasted_iota(jnp.int32, (BC, BC), 1)
    eye = (ri == ci).astype(jnp.float32)                  # identity built in-kernel

    def masked_softmax(s):
        s = s + neg_mask
        m = jnp.max(s, axis=-1, keepdims=True)
        e = jnp.exp(s - m)
        return e / jnp.sum(e, axis=-1, keepdims=True)

    # ---- fused input projection: x @ [dgc_w1 | q | k | v]  (lane-dense 128) ----
    xp = _dot(X, wide[:, 0:4 * D]) + vec[0:1, 0:4 * D]    # (BC, 128)
    h0 = xp[:, 0:H]
    Q = xp[:, H:2 * H]
    K = xp[:, 2 * H:3 * H]
    V = xp[:, 3 * H:4 * H]

    # ---------------- DynamicGraphConvolution ----------------
    xc = X - jnp.mean(X, axis=1, keepdims=True)
    cov = _dot_t(xc, xc)                                  # (BC, BC)
    # torch.std default is unbiased (divide by D-1)
    std = jnp.sqrt(jnp.sum(xc * xc, axis=1, keepdims=True) * (1.0 / (D - 1)))
    std_row = jnp.sum(eye * std, axis=0, keepdims=True)   # exact (1,BC) "transpose"
    A = (cov / (std * std_row + 1e-8)) * block_f          # zero cross-sample entries
    A_hat = A + eye
    deg = jnp.sum(A_hat, axis=1, keepdims=True)           # (BC, 1) row sums
    # TODO(synk): the reference does deg**-0.5 unguarded (NaN for deg<=0); guard
    # only to keep results finite in that degenerate case.
    deg = jnp.where(deg > 0.0, deg, 1.0)
    dinv = lax.rsqrt(deg)
    dinv_row = jnp.sum(eye * dinv, axis=0, keepdims=True)
    L = dinv * A_hat * dinv_row                           # D^-1/2 A_hat D^-1/2

    s1 = jnp.maximum(_dot(L, h0), 0.0)
    s2 = _dot(s1, sq_ref[0]) + vec[1:2, 0:H]
    spatial = jnp.maximum(_dot(L, s2), 0.0)               # (BC, H)

    # ---------------- TemporalSelfAttention ----------------
    attn = masked_softmax(_dot_t(Q, K) * (1.0 / math.sqrt(D)))
    ctx = _dot(attn, V)
    o1 = _layernorm(ctx + X, vec[4:5, 0:D], vec[5:6, 0:D])
    f = jnp.maximum(_dot(o1, sq_ref[1]) + vec[2:3, 0:D], 0.0)
    f = _dot(f, sq_ref[2]) + vec[3:4, 0:D]
    temporal = _layernorm(o1 + f, vec[6:7, 0:D], vec[7:8, 0:D])   # (BC, D)

    # ---------------- CrossAttentionFusion x2 ----------------
    def caf(q_in, kv_in, q_w, q_b, kv_w, kv_b, f1_w, f1_b, f2_w, f2_b):
        Qc = _dot(q_in, q_w) + q_b
        KV = _dot(kv_in, kv_w) + kv_b                     # fused K|V projection
        Kc = KV[:, 0:H]
        Vc = KV[:, H:2 * H]
        at = masked_softmax(_dot_t(Qc, Kc) * (1.0 / math.sqrt(H)))
        hh = _dot(at, Vc) + q_in
        ff = jnp.maximum(_dot(hh, f1_w) + f1_b, 0.0)
        return _dot(ff, f2_w) + f2_b

    fused1 = caf(spatial, temporal,
                 sq_ref[3], vec[8:9, 0:H],
                 wide[:, 4 * D:4 * D + 2 * H], vec[9:10, 0:2 * H],
                 sq_ref[4], vec[10:11, 0:H],
                 sq_ref[5], vec[11:12, 0:H])
    fused2 = caf(temporal, fused1,
                 sq_ref[6], vec[12:13, 0:H],
                 wide[:, 4 * D + 2 * H:4 * D + 4 * H], vec[13:14, 0:2 * H],
                 sq_ref[7], vec[14:15, 0:H],
                 sq_ref[8], vec[15:16, 0:H])              # (BC, H)

    # ---------------- Classifier head ----------------
    # Flatten via static masked stores into a (B, C*H) VMEM scratch, then one
    # MXU contraction (replaces the previous 8-step serial accumulator loop).
    for b in range(B):
        for c in range(C):
            r = b * C + c
            flat_ref[b:b + 1, c * H:(c + 1) * H] = fused2[r:r + 1, :]
    flat = flat_ref[...]                                  # (B, C*H)
    hc = jnp.maximum(_dot(flat, w1_ref[...]) + vec[16:17, :], 0.0)   # (B, 128)
    # TODO(synk): Dropout(0.5) has no deterministic Pallas equivalent; treated as
    # inference-mode identity.
    w2t = vec[18:18 + num_classes, :]                     # (NC, 128) = clf_w2^T
    out_ref[...] = _dot_t(hc, w2t) + vec[17:18, 0:num_classes]


# ------------------------------ wrapper ---------------------------------------

def hn_dgts_forward(x, params, num_classes):
    B, C, D = x.shape
    wide, sq, vec, clf_w1 = params

    xf = x.reshape(B * C, D)                              # host-side, layout no-op
    bidx = jnp.repeat(jnp.arange(B, dtype=jnp.int32), C)
    block_f = (bidx[:, None] == bidx[None, :]).astype(jnp.float32)   # (BC, BC)

    kernel = functools.partial(_fused_kernel, B, C, num_classes)
    vmem = lambda: pl.BlockSpec(memory_space=pltpu.MemorySpace.VMEM)

    out = pl.pallas_call(
        kernel,
        out_shape=jax.ShapeDtypeStruct((B, num_classes), jnp.float32),
        in_specs=[vmem() for _ in range(6)],
        out_specs=vmem(),
        scratch_shapes=[pltpu.VMEM((B, C * D), jnp.float32)],
    )(xf, block_f, wide, sq, vec, clf_w1)
    return out


# ------------------------------ parameter packing ------------------------------

def init_params(key, C, D, H, num_classes):
    assert D == H, "reference module is only runnable with feature_dim == hidden_dim"
    keys = iter(jax.random.split(key, 48))

    def lin(fan_in, fan_out):
        k1, k2 = jax.random.split(next(keys))
        bound = 1.0 / math.sqrt(fan_in)
        w = jax.random.uniform(k1, (fan_in, fan_out), jnp.float32, -bound, bound)
        b = jax.random.uniform(k2, (fan_out,), jnp.float32, -bound, bound)
        return w, b

    dgc_w1, dgc_b1 = lin(D, H)
    dgc_w2, dgc_b2 = lin(H, H)

    t_qw, t_qb = lin(D, D)
    t_kw, t_kb = lin(D, D)
    t_vw, t_vb = lin(D, D)
    t_f1w, t_f1b = lin(D, D)
    t_f2w, t_f2b = lin(D, D)
    ln1_g = jnp.ones((D,), jnp.float32)
    ln1_b = jnp.zeros((D,), jnp.float32)
    ln2_g = jnp.ones((D,), jnp.float32)
    ln2_b = jnp.zeros((D,), jnp.float32)

    def caf_params():
        qw, qb = lin(H, H)
        kw, kb = lin(H, H)
        vw, vb = lin(H, H)
        f1w, f1b = lin(H, H)
        f2w, f2b = lin(H, H)
        return qw, qb, kw, kb, vw, vb, f1w, f1b, f2w, f2b

    (c1_qw, c1_qb, c1_kw, c1_kb, c1_vw, c1_vb,
     c1_f1w, c1_f1b, c1_f2w, c1_f2b) = caf_params()
    (c2_qw, c2_qb, c2_kw, c2_kb, c2_vw, c2_vb,
     c2_f1w, c2_f1b, c2_f2w, c2_f2b) = caf_params()

    clf_w1, clf_b1 = lin(C * H, 128)
    clf_w2, clf_b2 = lin(128, num_classes)

    # Slab 1: wide, lane-dense projection weights.
    wide = jnp.concatenate(
        [dgc_w1, t_qw, t_kw, t_vw, c1_kw, c1_vw, c2_kw, c2_vw], axis=1)  # (D, 4D+4H)

    # Slab 2: nine (H, H) square weights, indexed by leading dim in the kernel.
    sq = jnp.stack([dgc_w2, t_f1w, t_f2w,
                    c1_qw, c1_f1w, c1_f2w,
                    c2_qw, c2_f1w, c2_f2w], axis=0)                      # (9, H, H)

    # Slab 3: all biases / LN params / classifier-head vectors, one (rows,128) slab.
    def row(v):
        r = jnp.zeros((128,), jnp.float32)
        return r.at[:v.shape[0]].set(v.astype(jnp.float32))

    rows = jnp.stack([
        row(jnp.concatenate([dgc_b1, t_qb, t_kb, t_vb])),   # 0: fused xproj bias
        row(dgc_b2),                                        # 1
        row(t_f1b),                                         # 2
        row(t_f2b),                                         # 3
        row(ln1_g), row(ln1_b), row(ln2_g), row(ln2_b),     # 4..7
        row(c1_qb), row(jnp.concatenate([c1_kb, c1_vb])),   # 8, 9
        row(c1_f1b), row(c1_f2b),                           # 10, 11
        row(c2_qb), row(jnp.concatenate([c2_kb, c2_vb])),   # 12, 13
        row(c2_f1b), row(c2_f2b),                           # 14, 15
        row(clf_b1),                                        # 16
        row(clf_b2),                                        # 17
    ], axis=0)
    vec = jnp.concatenate([rows, clf_w2.T.astype(jnp.float32)], axis=0)  # (18+NC,128)

    return wide, sq, vec, clf_w1


# ---------------------------------- main ---------------------------------------

if __name__ == "__main__":
    B = 2
    channel_num = 8
    feature_dim = 32
    hidden_dim = 32       # must equal feature_dim for the reference module to run
    num_classes = 2

    key = jax.random.PRNGKey(0)
    k_x, k_p = jax.random.split(key)
    x = jax.random.normal(k_x, (B, channel_num, feature_dim), jnp.float32)
    params = init_params(k_p, channel_num, feature_dim, hidden_dim, num_classes)

    logits = hn_dgts_forward(x, params, num_classes)
    jax.block_until_ready(logits)
    assert logits.shape == (B, num_classes)
    assert bool(jnp.all(jnp.isfinite(logits)))
    print("KERNEL_OK")
</pallas_src>

<mosaic_0001>
module attributes {stable_mosaic.version = 11 : i64} {
  func.func @_fused_kernel(%arg0: memref<16x32xf32, #tpu.memory_space<vmem>>, %arg1: memref<16x16xf32, #tpu.memory_space<vmem>>, %arg2: memref<32x256xf32, #tpu.memory_space<vmem>>, %arg3: memref<9x32x32xf32, #tpu.memory_space<vmem>>, %arg4: memref<20x128xf32, #tpu.memory_space<vmem>>, %arg5: memref<256x128xf32, #tpu.memory_space<vmem>>, %arg6: memref<2x2xf32, #tpu.memory_space<vmem>>, %arg7: memref<2x256xf32, #tpu.memory_space<vmem>>) attributes {dimension_semantics = [], scalar_prefetch = 0 : i64, scratch_operands = 1 : i64, tpu.core_type = #tpu.core_type<tc>} {
    %c0 = arith.constant 0 : index
    %c0_0 = arith.constant 0 : index
    %0 = vector.load %arg0[%c0, %c0_0] : memref<16x32xf32, #tpu.memory_space<vmem>>, vector<16x32xf32>
    %c0_1 = arith.constant 0 : index
    %c0_2 = arith.constant 0 : index
    %1 = vector.load %arg2[%c0_1, %c0_2] : memref<32x256xf32, #tpu.memory_space<vmem>>, vector<32x256xf32>
    %c0_3 = arith.constant 0 : index
    %c0_4 = arith.constant 0 : index
    %2 = vector.load %arg4[%c0_3, %c0_4] : memref<20x128xf32, #tpu.memory_space<vmem>>, vector<20x128xf32>
    %c0_5 = arith.constant 0 : index
    %c0_6 = arith.constant 0 : index
    %3 = vector.load %arg1[%c0_5, %c0_6] : memref<16x16xf32, #tpu.memory_space<vmem>>, vector<16x16xf32>
    %cst = arith.constant 1.000000e+00 : f32
    %4 = vector.broadcast %cst : f32 to vector<16x16xf32>
    %5 = arith.subf %4, %3 : vector<16x16xf32>
    %cst_7 = arith.constant -1.000000e+30 : f32
    %6 = vector.broadcast %cst_7 : f32 to vector<16x16xf32>
    %7 = arith.mulf %5, %6 : vector<16x16xf32>
    %8 = tpu.iota {dimensions = array<i32: 0>} : vector<16x16xi32>
    %9 = tpu.iota {dimensions = array<i32: 1>} : vector<16x16xi32>
    %10 = arith.cmpi eq, %8, %9 : vector<16x16xi32>
    %11 = arith.extui %10 : vector<16x16xi1> to vector<16x16xi32>
    %12 = arith.sitofp %11 : vector<16x16xi32> to vector<16x16xf32>
    %13 = vector.extract_strided_slice %1 {offsets = [0, 0], sizes = [32, 128], strides = [1, 1]} : vector<32x256xf32> to vector<32x128xf32>
    %cst_8 = arith.constant dense<0.000000e+00> : vector<16x128xf32>
    %14 = tpu.matmul %0, %13, %cst_8 {dimension_numbers = #tpu.dot_dimension_numbers<[1], [0], [0], [1], [0, 0, 1, 1], [], []>} : vector<16x32xf32>, vector<32x128xf32>, vector<16x128xf32> -> vector<16x128xf32>
    %15 = vector.extract_strided_slice %2 {offsets = [0, 0], sizes = [1, 128], strides = [1, 1]} : vector<20x128xf32> to vector<1x128xf32>
    %16 = vector.broadcast %15 : vector<1x128xf32> to vector<16x128xf32>
    %17 = arith.addf %14, %16 : vector<16x128xf32>
    %18 = vector.extract_strided_slice %17 {offsets = [0, 0], sizes = [16, 32], strides = [1, 1]} : vector<16x128xf32> to vector<16x32xf32>
    %19 = vector.extract_strided_slice %17 {offsets = [0, 32], sizes = [16, 32], strides = [1, 1]} : vector<16x128xf32> to vector<16x32xf32>
    %20 = vector.extract_strided_slice %17 {offsets = [0, 64], sizes = [16, 32], strides = [1, 1]} : vector<16x128xf32> to vector<16x32xf32>
    %21 = vector.extract_strided_slice %17 {offsets = [0, 96], sizes = [16, 32], strides = [1, 1]} : vector<16x128xf32> to vector<16x32xf32>
    %cst_9 = arith.constant dense<0.000000e+00> : vector<16xf32>
    %22 = vector.multi_reduction <add>, %0, %cst_9 [1] : vector<16x32xf32> to vector<16xf32>
    %23 = vector.shape_cast %22 : vector<16xf32> to vector<16x1xf32>
    %cst_10 = arith.constant 3.200000e+01 : f32
    %24 = vector.broadcast %cst_10 : f32 to vector<16x1xf32>
    %25 = arith.divf %23, %24 : vector<16x1xf32>
    %26 = vector.broadcast %25 : vector<16x1xf32> to vector<16x32xf32>
    %27 = arith.subf %0, %26 : vector<16x32xf32>
    %cst_11 = arith.constant dense<0.000000e+00> : vector<16x16xf32>
    %28 = tpu.matmul %27, %27, %cst_11 {dimension_numbers = #tpu.dot_dimension_numbers<[1], [1], [0], [0], [0, 0, 1, 0], [], []>} : vector<16x32xf32>, vector<16x32xf32>, vector<16x16xf32> -> vector<16x16xf32>
    %29 = arith.mulf %27, %27 : vector<16x32xf32>
    %cst_12 = arith.constant dense<0.000000e+00> : vector<16xf32>
    %30 = vector.multi_reduction <add>, %29, %cst_12 [1] : vector<16x32xf32> to vector<16xf32>
    %31 = vector.shape_cast %30 : vector<16xf32> to vector<16x1xf32>
    %cst_13 = arith.constant 0.0322580636 : f32
    %32 = vector.broadcast %cst_13 : f32 to vector<16x1xf32>
    %33 = arith.mulf %31, %32 : vector<16x1xf32>
    %34 = math.sqrt %33 : vector<16x1xf32>
    %35 = vector.broadcast %34 : vector<16x1xf32> to vector<16x16xf32>
    %36 = arith.mulf %12, %35 : vector<16x16xf32>
    %cst_14 = arith.constant dense<0.000000e+00> : vector<16xf32>
    %37 = vector.multi_reduction <add>, %36, %cst_14 [0] : vector<16x16xf32> to vector<16xf32>
    %38 = vector.shape_cast %37 : vector<16xf32> to vector<1x16xf32>
    %39 = vector.broadcast %34 : vector<16x1xf32> to vector<16x16xf32>
    %40 = vector.broadcast %38 : vector<1x16xf32> to vector<16x16xf32>
    %41 = arith.mulf %39, %40 : vector<16x16xf32>
    %cst_15 = arith.constant 9.99999993E-9 : f32
    %42 = vector.broadcast %cst_15 : f32 to vector<16x16xf32>
    %43 = arith.addf %41, %42 : vector<16x16xf32>
    %44 = arith.divf %28, %43 : vector<16x16xf32>
    %45 = arith.mulf %44, %3 : vector<16x16xf32>
    %46 = arith.addf %45, %12 : vector<16x16xf32>
    %cst_16 = arith.constant dense<0.000000e+00> : vector<16xf32>
    %47 = vector.multi_reduction <add>, %46, %cst_16 [1] : vector<16x16xf32> to vector<16xf32>
    %48 = vector.shape_cast %47 : vector<16xf32> to vector<16x1xf32>
    %cst_17 = arith.constant 0.000000e+00 : f32
    %49 = vector.broadcast %cst_17 : f32 to vector<16x1xf32>
    %50 = arith.cmpf ogt, %48, %49 : vector<16x1xf32>
    %cst_18 = arith.constant 1.000000e+00 : f32
    %51 = vector.broadcast %cst_18 : f32 to vector<16x1xf32>
    %52 = arith.select %50, %48, %51 : vector<16x1xi1>, vector<16x1xf32>
    %53 = math.rsqrt %52 : vector<16x1xf32>
    %54 = vector.broadcast %53 : vector<16x1xf32> to vector<16x16xf32>
    %55 = arith.mulf %12, %54 : vector<16x16xf32>
    %cst_19 = arith.constant dense<0.000000e+00> : vector<16xf32>
    %56 = vector.multi_reduction <add>, %55, %cst_19 [0] : vector<16x16xf32> to vector<16xf32>
    %57 = vector.shape_cast %56 : vector<16xf32> to vector<1x16xf32>
    %58 = vector.broadcast %53 : vector<16x1xf32> to vector<16x16xf32>
    %59 = arith.mulf %58, %46 : vector<16x16xf32>
    %60 = vector.broadcast %57 : vector<1x16xf32> to vector<16x16xf32>
    %61 = arith.mulf %59, %60 : vector<16x16xf32>
    %cst_20 = arith.constant dense<0.000000e+00> : vector<16x32xf32>
    %62 = tpu.matmul %61, %18, %cst_20 {dimension_numbers = #tpu.dot_dimension_numbers<[1], [0], [0], [1], [0, 0, 1, 1], [], []>} : vector<16x16xf32>, vector<16x32xf32>, vector<16x32xf32> -> vector<16x32xf32>
    %cst_21 = arith.constant 0.000000e+00 : f32
    %63 = vector.broadcast %cst_21 : f32 to vector<16x32xf32>
    %64 = arith.maximumf %62, %63 : vector<16x32xf32>
    %c0_22 = arith.constant 0 : index
    %c0_23 = arith.constant 0 : index
    %c0_24 = arith.constant 0 : index
    %65 = vector.load %arg3[%c0_22, %c0_23, %c0_24] : memref<9x32x32xf32, #tpu.memory_space<vmem>>, vector<1x32x32xf32>
    %66 = vector.shape_cast %65 : vector<1x32x32xf32> to vector<32x32xf32>
    %cst_25 = arith.constant dense<0.000000e+00> : vector<16x32xf32>
    %67 = tpu.matmul %64, %66, %cst_25 {dimension_numbers = #tpu.dot_dimension_numbers<[1], [0], [0], [1], [0, 0, 1, 1], [], []>} : vector<16x32xf32>, vector<32x32xf32>, vector<16x32xf32> -> vector<16x32xf32>
    %68 = vector.extract_strided_slice %2 {offsets = [1, 0], sizes = [1, 32], strides = [1, 1]} : vector<20x128xf32> to vector<1x32xf32>
    %69 = vector.broadcast %68 : vector<1x32xf32> to vector<16x32xf32>
    %70 = arith.addf %67, %69 : vector<16x32xf32>
    %cst_26 = arith.constant dense<0.000000e+00> : vector<16x32xf32>
    %71 = tpu.matmul %61, %70, %cst_26 {dimension_numbers = #tpu.dot_dimension_numbers<[1], [0], [0], [1], [0, 0, 1, 1], [], []>} : vector<16x16xf32>, vector<16x32xf32>, vector<16x32xf32> -> vector<16x32xf32>
    %cst_27 = arith.constant 0.000000e+00 : f32
    %72 = vector.broadcast %cst_27 : f32 to vector<16x32xf32>
    %73 = arith.maximumf %71, %72 : vector<16x32xf32>
    %cst_28 = arith.constant dense<0.000000e+00> : vector<16x16xf32>
    %74 = tpu.matmul %19, %20, %cst_28 {dimension_numbers = #tpu.dot_dimension_numbers<[1], [1], [0], [0], [0, 0, 1, 0], [], []>} : vector<16x32xf32>, vector<16x32xf32>, vector<16x16xf32> -> vector<16x16xf32>
    %cst_29 = arith.constant 0.176776692 : f32
    %75 = vector.broadcast %cst_29 : f32 to vector<16x16xf32>
    %76 = arith.mulf %74, %75 : vector<16x16xf32>
    %77 = arith.addf %76, %7 : vector<16x16xf32>
    %cst_30 = arith.constant dense<0xFF800000> : vector<16xf32>
    %78 = vector.multi_reduction <maximumf>, %77, %cst_30 [1] : vector<16x16xf32> to vector<16xf32>
    %79 = vector.shape_cast %78 : vector<16xf32> to vector<16x1xf32>
    %80 = vector.broadcast %79 : vector<16x1xf32> to vector<16x16xf32>
    %81 = arith.subf %77, %80 : vector<16x16xf32>
    %82 = math.exp %81 : vector<16x16xf32>
    %cst_31 = arith.constant dense<0.000000e+00> : vector<16xf32>
    %83 = vector.multi_reduction <add>, %82, %cst_31 [1] : vector<16x16xf32> to vector<16xf32>
    %84 = vector.shape_cast %83 : vector<16xf32> to vector<16x1xf32>
    %85 = vector.broadcast %84 : vector<16x1xf32> to vector<16x16xf32>
    %86 = arith.divf %82, %85 : vector<16x16xf32>
    %cst_32 = arith.constant dense<0.000000e+00> : vector<16x32xf32>
    %87 = tpu.matmul %86, %21, %cst_32 {dimension_numbers = #tpu.dot_dimension_numbers<[1], [0], [0], [1], [0, 0, 1, 1], [], []>} : vector<16x16xf32>, vector<16x32xf32>, vector<16x32xf32> -> vector<16x32xf32>
    %88 = arith.addf %87, %0 : vector<16x32xf32>
    %89 = vector.extract_strided_slice %2 {offsets = [4, 0], sizes = [1, 32], strides = [1, 1]} : vector<20x128xf32> to vector<1x32xf32>
    %90 = vector.extract_strided_slice %2 {offsets = [5, 0], sizes = [1, 32], strides = [1, 1]} : vector<20x128xf32> to vector<1x32xf32>
    %cst_33 = arith.constant dense<0.000000e+00> : vector<16xf32>
    %91 = vector.multi_reduction <add>, %88, %cst_33 [1] : vector<16x32xf32> to vector<16xf32>
    %92 = vector.shape_cast %91 : vector<16xf32> to vector<16x1xf32>
    %cst_34 = arith.constant 3.200000e+01 : f32
    %93 = vector.broadcast %cst_34 : f32 to vector<16x1xf32>
    %94 = arith.divf %92, %93 : vector<16x1xf32>
    %95 = vector.broadcast %94 : vector<16x1xf32> to vector<16x32xf32>
    %96 = arith.subf %88, %95 : vector<16x32xf32>
    %97 = arith.mulf %96, %96 : vector<16x32xf32>
    %cst_35 = arith.constant dense<0.000000e+00> : vector<16xf32>
    %98 = vector.multi_reduction <add>, %97, %cst_35 [1] : vector<16x32xf32> to vector<16xf32>
    %99 = vector.shape_cast %98 : vector<16xf32> to vector<16x1xf32>
    %cst_36 = arith.constant 3.200000e+01 : f32
    %100 = vector.broadcast %cst_36 : f32 to vector<16x1xf32>
    %101 = arith.divf %99, %100 : vector<16x1xf32>
    %102 = vector.broadcast %94 : vector<16x1xf32> to vector<16x32xf32>
    %103 = arith.subf %88, %102 : vector<16x32xf32>
    %cst_37 = arith.constant 9.99999974E-6 : f32
    %104 = vector.broadcast %cst_37 : f32 to vector<16x1xf32>
    %105 = arith.addf %101, %104 : vector<16x1xf32>
    %106 = math.rsqrt %105 : vector<16x1xf32>
    %107 = vector.broadcast %106 : vector<16x1xf32> to vector<16x32xf32>
    %108 = arith.mulf %103, %107 : vector<16x32xf32>
    %109 = vector.broadcast %89 : vector<1x32xf32> to vector<16x32xf32>
    %110 = arith.mulf %108, %109 : vector<16x32xf32>
    %111 = vector.broadcast %90 : vector<1x32xf32> to vector<16x32xf32>
    %112 = arith.addf %110, %111 : vector<16x32xf32>
    %c1 = arith.constant 1 : index
    %c0_38 = arith.constant 0 : index
    %c0_39 = arith.constant 0 : index
    %113 = vector.load %arg3[%c1, %c0_38, %c0_39] : memref<9x32x32xf32, #tpu.memory_space<vmem>>, vector<1x32x32xf32>
    %114 = vector.shape_cast %113 : vector<1x32x32xf32> to vector<32x32xf32>
    %cst_40 = arith.constant dense<0.000000e+00> : vector<16x32xf32>
    %115 = tpu.matmul %112, %114, %cst_40 {dimension_numbers = #tpu.dot_dimension_numbers<[1], [0], [0], [1], [0, 0, 1, 1], [], []>} : vector<16x32xf32>, vector<32x32xf32>, vector<16x32xf32> -> vector<16x32xf32>
    %116 = vector.extract_strided_slice %2 {offsets = [2, 0], sizes = [1, 32], strides = [1, 1]} : vector<20x128xf32> to vector<1x32xf32>
    %117 = vector.broadcast %116 : vector<1x32xf32> to vector<16x32xf32>
    %118 = arith.addf %115, %117 : vector<16x32xf32>
    %cst_41 = arith.constant 0.000000e+00 : f32
    %119 = vector.broadcast %cst_41 : f32 to vector<16x32xf32>
    %120 = arith.maximumf %118, %119 : vector<16x32xf32>
    %c2 = arith.constant 2 : index
    %c0_42 = arith.constant 0 : index
    %c0_43 = arith.constant 0 : index
    %121 = vector.load %arg3[%c2, %c0_42, %c0_43] : memref<9x32x32xf32, #tpu.memory_space<vmem>>, vector<1x32x32xf32>
    %122 = vector.shape_cast %121 : vector<1x32x32xf32> to vector<32x32xf32>
    %cst_44 = arith.constant dense<0.000000e+00> : vector<16x32xf32>
    %123 = tpu.matmul %120, %122, %cst_44 {dimension_numbers = #tpu.dot_dimension_numbers<[1], [0], [0], [1], [0, 0, 1, 1], [], []>} : vector<16x32xf32>, vector<32x32xf32>, vector<16x32xf32> -> vector<16x32xf32>
    %124 = vector.extract_strided_slice %2 {offsets = [3, 0], sizes = [1, 32], strides = [1, 1]} : vector<20x128xf32> to vector<1x32xf32>
    %125 = vector.broadcast %124 : vector<1x32xf32> to vector<16x32xf32>
    %126 = arith.addf %123, %125 : vector<16x32xf32>
    %127 = arith.addf %112, %126 : vector<16x32xf32>
    %128 = vector.extract_strided_slice %2 {offsets = [6, 0], sizes = [1, 32], strides = [1, 1]} : vector<20x128xf32> to vector<1x32xf32>
    %129 = vector.extract_strided_slice %2 {offsets = [7, 0], sizes = [1, 32], strides = [1, 1]} : vector<20x128xf32> to vector<1x32xf32>
    %cst_45 = arith.constant dense<0.000000e+00> : vector<16xf32>
    %130 = vector.multi_reduction <add>, %127, %cst_45 [1] : vector<16x32xf32> to vector<16xf32>
    %131 = vector.shape_cast %130 : vector<16xf32> to vector<16x1xf32>
    %cst_46 = arith.constant 3.200000e+01 : f32
    %132 = vector.broadcast %cst_46 : f32 to vector<16x1xf32>
    %133 = arith.divf %131, %132 : vector<16x1xf32>
    %134 = vector.broadcast %133 : vector<16x1xf32> to vector<16x32xf32>
    %135 = arith.subf %127, %134 : vector<16x32xf32>
    %136 = arith.mulf %135, %135 : vector<16x32xf32>
    %cst_47 = arith.constant dense<0.000000e+00> : vector<16xf32>
    %137 = vector.multi_reduction <add>, %136, %cst_47 [1] : vector<16x32xf32> to vector<16xf32>
    %138 = vector.shape_cast %137 : vector<16xf32> to vector<16x1xf32>
    %cst_48 = arith.constant 3.200000e+01 : f32
    %139 = vector.broadcast %cst_48 : f32 to vector<16x1xf32>
    %140 = arith.divf %138, %139 : vector<16x1xf32>
    %141 = vector.broadcast %133 : vector<16x1xf32> to vector<16x32xf32>
    %142 = arith.subf %127, %141 : vector<16x32xf32>
    %cst_49 = arith.constant 9.99999974E-6 : f32
    %143 = vector.broadcast %cst_49 : f32 to vector<16x1xf32>
    %144 = arith.addf %140, %143 : vector<16x1xf32>
    %145 = math.rsqrt %144 : vector<16x1xf32>
    %146 = vector.broadcast %145 : vector<16x1xf32> to vector<16x32xf32>
    %147 = arith.mulf %142, %146 : vector<16x32xf32>
    %148 = vector.broadcast %128 : vector<1x32xf32> to vector<16x32xf32>
    %149 = arith.mulf %147, %148 : vector<16x32xf32>
    %150 = vector.broadcast %129 : vector<1x32xf32> to vector<16x32xf32>
    %151 = arith.addf %149, %150 : vector<16x32xf32>
    %c3 = arith.constant 3 : index
    %c0_50 = arith.constant 0 : index
    %c0_51 = arith.constant 0 : index
    %152 = vector.load %arg3[%c3, %c0_50, %c0_51] : memref<9x32x32xf32, #tpu.memory_space<vmem>>, vector<1x32x32xf32>
    %153 = vector.shape_cast %152 : vector<1x32x32xf32> to vector<32x32xf32>
    %154 = vector.extract_strided_slice %2 {offsets = [8, 0], sizes = [1, 32], strides = [1, 1]} : vector<20x128xf32> to vector<1x32xf32>
    %155 = vector.extract_strided_slice %1 {offsets = [0, 128], sizes = [32, 64], strides = [1, 1]} : vector<32x256xf32> to vector<32x64xf32>
    %156 = vector.extract_strided_slice %2 {offsets = [9, 0], sizes = [1, 64], strides = [1, 1]} : vector<20x128xf32> to vector<1x64xf32>
    %c4 = arith.constant 4 : index
    %c0_52 = arith.constant 0 : index
    %c0_53 = arith.constant 0 : index
    %157 = vector.load %arg3[%c4, %c0_52, %c0_53] : memref<9x32x32xf32, #tpu.memory_space<vmem>>, vector<1x32x32xf32>
    %158 = vector.shape_cast %157 : vector<1x32x32xf32> to vector<32x32xf32>
    %159 = vector.extract_strided_slice %2 {offsets = [10, 0], sizes = [1, 32], strides = [1, 1]} : vector<20x128xf32> to vector<1x32xf32>
    %c5 = arith.constant 5 : index
    %c0_54 = arith.constant 0 : index
    %c0_55 = arith.constant 0 : index
    %160 = vector.load %arg3[%c5, %c0_54, %c0_55] : memref<9x32x32xf32, #tpu.memory_space<vmem>>, vector<1x32x32xf32>
    %161 = vector.shape_cast %160 : vector<1x32x32xf32> to vector<32x32xf32>
    %162 = vector.extract_strided_slice %2 {offsets = [11, 0], sizes = [1, 32], strides = [1, 1]} : vector<20x128xf32> to vector<1x32xf32>
    %cst_56 = arith.constant dense<0.000000e+00> : vector<16x32xf32>
    %163 = tpu.matmul %73, %153, %cst_56 {dimension_numbers = #tpu.dot_dimension_numbers<[1], [0], [0], [1], [0, 0, 1, 1], [], []>} : vector<16x32xf32>, vector<32x32xf32>, vector<16x32xf32> -> vector<16x32xf32>
    %164 = vector.broadcast %154 : vector<1x32xf32> to vector<16x32xf32>
    %165 = arith.addf %163, %164 : vector<16x32xf32>
    %cst_57 = arith.constant dense<0.000000e+00> : vector<16x64xf32>
    %166 = tpu.matmul %151, %155, %cst_57 {dimension_numbers = #tpu.dot_dimension_numbers<[1], [0], [0], [1], [0, 0, 1, 1], [], []>} : vector<16x32xf32>, vector<32x64xf32>, vector<16x64xf32> -> vector<16x64xf32>
    %167 = vector.broadcast %156 : vector<1x64xf32> to vector<16x64xf32>
    %168 = arith.addf %166, %167 : vector<16x64xf32>
    %169 = vector.extract_strided_slice %168 {offsets = [0, 0], sizes = [16, 32], strides = [1, 1]} : vector<16x64xf32> to vector<16x32xf32>
    %170 = vector.extract_strided_slice %168 {offsets = [0, 32], sizes = [16, 32], strides = [1, 1]} : vector<16x64xf32> to vector<16x32xf32>
    %cst_58 = arith.constant dense<0.000000e+00> : vector<16x16xf32>
    %171 = tpu.matmul %165, %169, %cst_58 {dimension_numbers = #tpu.dot_dimension_numbers<[1], [1], [0], [0], [0, 0, 1, 0], [], []>} : vector<16x32xf32>, vector<16x32xf32>, vector<16x16xf32> -> vector<16x16xf32>
    %cst_59 = arith.constant 0.176776692 : f32
    %172 = vector.broadcast %cst_59 : f32 to vector<16x16xf32>
    %173 = arith.mulf %171, %172 : vector<16x16xf32>
    %174 = arith.addf %173, %7 : vector<16x16xf32>
    %cst_60 = arith.constant dense<0xFF800000> : vector<16xf32>
    %175 = vector.multi_reduction <maximumf>, %174, %cst_60 [1] : vector<16x16xf32> to vector<16xf32>
    %176 = vector.shape_cast %175 : vector<16xf32> to vector<16x1xf32>
    %177 = vector.broadcast %176 : vector<16x1xf32> to vector<16x16xf32>
    %178 = arith.subf %174, %177 : vector<16x16xf32>
    %179 = math.exp %178 : vector<16x16xf32>
    %cst_61 = arith.constant dense<0.000000e+00> : vector<16xf32>
    %180 = vector.multi_reduction <add>, %179, %cst_61 [1] : vector<16x16xf32> to vector<16xf32>
    %181 = vector.shape_cast %180 : vector<16xf32> to vector<16x1xf32>
    %182 = vector.broadcast %181 : vector<16x1xf32> to vector<16x16xf32>
    %183 = arith.divf %179, %182 : vector<16x16xf32>
    %cst_62 = arith.constant dense<0.000000e+00> : vector<16x32xf32>
    %184 = tpu.matmul %183, %170, %cst_62 {dimension_numbers = #tpu.dot_dimension_numbers<[1], [0], [0], [1], [0, 0, 1, 1], [], []>} : vector<16x16xf32>, vector<16x32xf32>, vector<16x32xf32> -> vector<16x32xf32>
    %185 = arith.addf %184, %73 : vector<16x32xf32>
    %cst_63 = arith.constant dense<0.000000e+00> : vector<16x32xf32>
    %186 = tpu.matmul %185, %158, %cst_63 {dimension_numbers = #tpu.dot_dimension_numbers<[1], [0], [0], [1], [0, 0, 1, 1], [], []>} : vector<16x32xf32>, vector<32x32xf32>, vector<16x32xf32> -> vector<16x32xf32>
    %187 = vector.broadcast %159 : vector<1x32xf32> to vector<16x32xf32>
    %188 = arith.addf %186, %187 : vector<16x32xf32>
    %cst_64 = arith.constant 0.000000e+00 : f32
    %189 = vector.broadcast %cst_64 : f32 to vector<16x32xf32>
    %190 = arith.maximumf %188, %189 : vector<16x32xf32>
    %cst_65 = arith.constant dense<0.000000e+00> : vector<16x32xf32>
    %191 = tpu.matmul %190, %161, %cst_65 {dimension_numbers = #tpu.dot_dimension_numbers<[1], [0], [0], [1], [0, 0, 1, 1], [], []>} : vector<16x32xf32>, vector<32x32xf32>, vector<16x32xf32> -> vector<16x32xf32>
    %192 = vector.broadcast %162 : vector<1x32xf32> to vector<16x32xf32>
    %193 = arith.addf %191, %192 : vector<16x32xf32>
    %c6 = arith.constant 6 : index
    %c0_66 = arith.constant 0 : index
    %c0_67 = arith.constant 0 : index
    %194 = vector.load %arg3[%c6, %c0_66, %c0_67] : memref<9x32x32xf32, #tpu.memory_space<vmem>>, vector<1x32x32xf32>
    %195 = vector.shape_cast %194 : vector<1x32x32xf32> to vector<32x32xf32>
    %196 = vector.extract_strided_slice %2 {offsets = [12, 0], sizes = [1, 32], strides = [1, 1]} : vector<20x128xf32> to vector<1x32xf32>
    %197 = vector.extract_strided_slice %1 {offsets = [0, 192], sizes = [32, 64], strides = [1, 1]} : vector<32x256xf32> to vector<32x64xf32>
    %198 = vector.extract_strided_slice %2 {offsets = [13, 0], sizes = [1, 64], strides = [1, 1]} : vector<20x128xf32> to vector<1x64xf32>
    %c7 = arith.constant 7 : index
    %c0_68 = arith.constant 0 : index
    %c0_69 = arith.constant 0 : index
    %199 = vector.load %arg3[%c7, %c0_68, %c0_69] : memref<9x32x32xf32, #tpu.memory_space<vmem>>, vector<1x32x32xf32>
    %200 = vector.shape_cast %199 : vector<1x32x32xf32> to vector<32x32xf32>
    %201 = vector.extract_strided_slice %2 {offsets = [14, 0], sizes = [1, 32], strides = [1, 1]} : vector<20x128xf32> to vector<1x32xf32>
    %c8 = arith.constant 8 : index
    %c0_70 = arith.constant 0 : index
    %c0_71 = arith.constant 0 : index
    %202 = vector.load %arg3[%c8, %c0_70, %c0_71] : memref<9x32x32xf32, #tpu.memory_space<vmem>>, vector<1x32x32xf32>
    %203 = vector.shape_cast %202 : vector<1x32x32xf32> to vector<32x32xf32>
    %204 = vector.extract_strided_slice %2 {offsets = [15, 0], sizes = [1, 32], strides = [1, 1]} : vector<20x128xf32> to vector<1x32xf32>
    %cst_72 = arith.constant dense<0.000000e+00> : vector<16x32xf32>
    %205 = tpu.matmul %151, %195, %cst_72 {dimension_numbers = #tpu.dot_dimension_numbers<[1], [0], [0], [1], [0, 0, 1, 1], [], []>} : vector<16x32xf32>, vector<32x32xf32>, vector<16x32xf32> -> vector<16x32xf32>
    %206 = vector.broadcast %196 : vector<1x32xf32> to vector<16x32xf32>
    %207 = arith.addf %205, %206 : vector<16x32xf32>
    %cst_73 = arith.constant dense<0.000000e+00> : vector<16x64xf32>
    %208 = tpu.matmul %193, %197, %cst_73 {dimension_numbers = #tpu.dot_dimension_numbers<[1], [0], [0], [1], [0, 0, 1, 1], [], []>} : vector<16x32xf32>, vector<32x64xf32>, vector<16x64xf32> -> vector<16x64xf32>
    %209 = vector.broadcast %198 : vector<1x64xf32> to vector<16x64xf32>
    %210 = arith.addf %208, %209 : vector<16x64xf32>
    %211 = vector.extract_strided_slice %210 {offsets = [0, 0], sizes = [16, 32], strides = [1, 1]} : vector<16x64xf32> to vector<16x32xf32>
    %212 = vector.extract_strided_slice %210 {offsets = [0, 32], sizes = [16, 32], strides = [1, 1]} : vector<16x64xf32> to vector<16x32xf32>
    %cst_74 = arith.constant dense<0.000000e+00> : vector<16x16xf32>
    %213 = tpu.matmul %207, %211, %cst_74 {dimension_numbers = #tpu.dot_dimension_numbers<[1], [1], [0], [0], [0, 0, 1, 0], [], []>} : vector<16x32xf32>, vector<16x32xf32>, vector<16x16xf32> -> vector<16x16xf32>
    %cst_75 = arith.constant 0.176776692 : f32
    %214 = vector.broadcast %cst_75 : f32 to vector<16x16xf32>
    %215 = arith.mulf %213, %214 : vector<16x16xf32>
    %216 = arith.addf %215, %7 : vector<16x16xf32>
    %cst_76 = arith.constant dense<0xFF800000> : vector<16xf32>
    %217 = vector.multi_reduction <maximumf>, %216, %cst_76 [1] : vector<16x16xf32> to vector<16xf32>
    %218 = vector.shape_cast %217 : vector<16xf32> to vector<16x1xf32>
    %219 = vector.broadcast %218 : vector<16x1xf32> to vector<16x16xf32>
    %220 = arith.subf %216, %219 : vector<16x16xf32>
    %221 = math.exp %220 : vector<16x16xf32>
    %cst_77 = arith.constant dense<0.000000e+00> : vector<16xf32>
    %222 = vector.multi_reduction <add>, %221, %cst_77 [1] : vector<16x16xf32> to vector<16xf32>
    %223 = vector.shape_cast %222 : vector<16xf32> to vector<16x1xf32>
    %224 = vector.broadcast %223 : vector<16x1xf32> to vector<16x16xf32>
    %225 = arith.divf %221, %224 : vector<16x16xf32>
    %cst_78 = arith.constant dense<0.000000e+00> : vector<16x32xf32>
    %226 = tpu.matmul %225, %212, %cst_78 {dimension_numbers = #tpu.dot_dimension_numbers<[1], [0], [0], [1], [0, 0, 1, 1], [], []>} : vector<16x16xf32>, vector<16x32xf32>, vector<16x32xf32> -> vector<16x32xf32>
    %227 = arith.addf %226, %151 : vector<16x32xf32>
    %cst_79 = arith.constant dense<0.000000e+00> : vector<16x32xf32>
    %228 = tpu.matmul %227, %200, %cst_79 {dimension_numbers = #tpu.dot_dimension_numbers<[1], [0], [0], [1], [0, 0, 1, 1], [], []>} : vector<16x32xf32>, vector<32x32xf32>, vector<16x32xf32> -> vector<16x32xf32>
    %229 = vector.broadcast %201 : vector<1x32xf32> to vector<16x32xf32>
    %230 = arith.addf %228, %229 : vector<16x32xf32>
    %cst_80 = arith.constant 0.000000e+00 : f32
    %231 = vector.broadcast %cst_80 : f32 to vector<16x32xf32>
    %232 = arith.maximumf %230, %231 : vector<16x32xf32>
    %cst_81 = arith.constant dense<0.000000e+00> : vector<16x32xf32>
    %233 = tpu.matmul %232, %203, %cst_81 {dimension_numbers = #tpu.dot_dimension_numbers<[1], [0], [0], [1], [0, 0, 1, 1], [], []>} : vector<16x32xf32>, vector<32x32xf32>, vector<16x32xf32> -> vector<16x32xf32>
    %234 = vector.broadcast %204 : vector<1x32xf32> to vector<16x32xf32>
    %235 = arith.addf %233, %234 : vector<16x32xf32>
    %236 = vector.extract_strided_slice %235 {offsets = [0, 0], sizes = [1, 32], strides = [1, 1]} : vector<16x32xf32> to vector<1x32xf32>
    %c0_82 = arith.constant 0 : index
    %c0_83 = arith.constant 0 : index
    %237 = vector.load %arg7[%c0_82, %c0_83] : memref<2x256xf32, #tpu.memory_space<vmem>>, vector<1x32xf32>
    tpu.vector_store %arg7[%c0_82, %c0_83], %236 {strides = array<i32>} : memref<2x256xf32, #tpu.memory_space<vmem>>, vector<1x32xf32>,
    %238 = vector.extract_strided_slice %235 {offsets = [1, 0], sizes = [1, 32], strides = [1, 1]} : vector<16x32xf32> to vector<1x32xf32>
    %c0_84 = arith.constant 0 : index
    %c32 = arith.constant 32 : index
    %239 = vector.load %arg7[%c0_84, %c32] : memref<2x256xf32, #tpu.memory_space<vmem>>, vector<1x32xf32>
    tpu.vector_store %arg7[%c0_84, %c32], %238 {strides = array<i32>} : memref<2x256xf32, #tpu.memory_space<vmem>>, vector<1x32xf32>,
    %240 = vector.extract_strided_slice %235 {offsets = [2, 0], sizes = [1, 32], strides = [1, 1]} : vector<16x32xf32> to vector<1x32xf32>
    %c0_85 = arith.constant 0 : index
    %c64 = arith.constant 64 : index
    %241 = vector.load %arg7[%c0_85, %c64] : memref<2x256xf32, #tpu.memory_space<vmem>>, vector<1x32xf32>
    tpu.vector_store %arg7[%c0_85, %c64], %240 {strides = array<i32>} : memref<2x256xf32, #tpu.memory_space<vmem>>, vector<1x32xf32>,
    %242 = vector.extract_strided_slice %235 {offsets = [3, 0], sizes = [1, 32], strides = [1, 1]} : vector<16x32xf32> to vector<1x32xf32>
    %c0_86 = arith.constant 0 : index
    %c96 = arith.constant 96 : index
    %243 = vector.load %arg7[%c0_86, %c96] : memref<2x256xf32, #tpu.memory_space<vmem>>, vector<1x32xf32>
    tpu.vector_store %arg7[%c0_86, %c96], %242 {strides = array<i32>} : memref<2x256xf32, #tpu.memory_space<vmem>>, vector<1x32xf32>,
    %244 = vector.extract_strided_slice %235 {offsets = [4, 0], sizes = [1, 32], strides = [1, 1]} : vector<16x32xf32> to vector<1x32xf32>
    %c0_87 = arith.constant 0 : index
    %c128 = arith.constant 128 : index
    %245 = vector.load %arg7[%c0_87, %c128] : memref<2x256xf32, #tpu.memory_space<vmem>>, vector<1x32xf32>
    tpu.vector_store %arg7[%c0_87, %c128], %244 {strides = array<i32>} : memref<2x256xf32, #tpu.memory_space<vmem>>, vector<1x32xf32>,
    %246 = vector.extract_strided_slice %235 {offsets = [5, 0], sizes = [1, 32], strides = [1, 1]} : vector<16x32xf32> to vector<1x32xf32>
    %c0_88 = arith.constant 0 : index
    %c160 = arith.constant 160 : index
    %247 = vector.load %arg7[%c0_88, %c160] : memref<2x256xf32, #tpu.memory_space<vmem>>, vector<1x32xf32>
    tpu.vector_store %arg7[%c0_88, %c160], %246 {strides = array<i32>} : memref<2x256xf32, #tpu.memory_space<vmem>>, vector<1x32xf32>,
    %248 = vector.extract_strided_slice %235 {offsets = [6, 0], sizes = [1, 32], strides = [1, 1]} : vector<16x32xf32> to vector<1x32xf32>
    %c0_89 = arith.constant 0 : index
    %c192 = arith.constant 192 : index
    %249 = vector.load %arg7[%c0_89, %c192] : memref<2x256xf32, #tpu.memory_space<vmem>>, vector<1x32xf32>
    tpu.vector_store %arg7[%c0_89, %c192], %248 {strides = array<i32>} : memref<2x256xf32, #tpu.memory_space<vmem>>, vector<1x32xf32>,
    %250 = vector.extract_strided_slice %235 {offsets = [7, 0], sizes = [1, 32], strides = [1, 1]} : vector<16x32xf32> to vector<1x32xf32>
    %c0_90 = arith.constant 0 : index
    %c224 = arith.constant 224 : index
    %251 = vector.load %arg7[%c0_90, %c224] : memref<2x256xf32, #tpu.memory_space<vmem>>, vector<1x32xf32>
    tpu.vector_store %arg7[%c0_90, %c224], %250 {strides = array<i32>} : memref<2x256xf32, #tpu.memory_space<vmem>>, vector<1x32xf32>,
    %252 = vector.extract_strided_slice %235 {offsets = [8, 0], sizes = [1, 32], strides = [1, 1]} : vector<16x32xf32> to vector<1x32xf32>
    %c1_91 = arith.constant 1 : index
    %c0_92 = arith.constant 0 : index
    %253 = vector.load %arg7[%c1_91, %c0_92] : memref<2x256xf32, #tpu.memory_space<vmem>>, vector<1x32xf32>
    tpu.vector_store %arg7[%c1_91, %c0_92], %252 {strides = array<i32>} : memref<2x256xf32, #tpu.memory_space<vmem>>, vector<1x32xf32>,
    %254 = vector.extract_strided_slice %235 {offsets = [9, 0], sizes = [1, 32], strides = [1, 1]} : vector<16x32xf32> to vector<1x32xf32>
    %c1_93 = arith.constant 1 : index
    %c32_94 = arith.constant 32 : index
    %255 = vector.load %arg7[%c1_93, %c32_94] : memref<2x256xf32, #tpu.memory_space<vmem>>, vector<1x32xf32>
    tpu.vector_store %arg7[%c1_93, %c32_94], %254 {strides = array<i32>} : memref<2x256xf32, #tpu.memory_space<vmem>>, vector<1x32xf32>,
    %256 = vector.extract_strided_slice %235 {offsets = [10, 0], sizes = [1, 32], strides = [1, 1]} : vector<16x32xf32> to vector<1x32xf32>
    %c1_95 = arith.constant 1 : index
    %c64_96 = arith.constant 64 : index
    %257 = vector.load %arg7[%c1_95, %c64_96] : memref<2x256xf32, #tpu.memory_space<vmem>>, vector<1x32xf32>
    tpu.vector_store %arg7[%c1_95, %c64_96], %256 {strides = array<i32>} : memref<2x256xf32, #tpu.memory_space<vmem>>, vector<1x32xf32>,
    %258 = vector.extract_strided_slice %235 {offsets = [11, 0], sizes = [1, 32], strides = [1, 1]} : vector<16x32xf32> to vector<1x32xf32>
    %c1_97 = arith.constant 1 : index
    %c96_98 = arith.constant 96 : index
    %259 = vector.load %arg7[%c1_97, %c96_98] : memref<2x256xf32, #tpu.memory_space<vmem>>, vector<1x32xf32>
    tpu.vector_store %arg7[%c1_97, %c96_98], %258 {strides = array<i32>} : memref<2x256xf32, #tpu.memory_space<vmem>>, vector<1x32xf32>,
    %260 = vector.extract_strided_slice %235 {offsets = [12, 0], sizes = [1, 32], strides = [1, 1]} : vector<16x32xf32> to vector<1x32xf32>
    %c1_99 = arith.constant 1 : index
    %c128_100 = arith.constant 128 : index
    %261 = vector.load %arg7[%c1_99, %c128_100] : memref<2x256xf32, #tpu.memory_space<vmem>>, vector<1x32xf32>
    tpu.vector_store %arg7[%c1_99, %c128_100], %260 {strides = array<i32>} : memref<2x256xf32, #tpu.memory_space<vmem>>, vector<1x32xf32>,
    %262 = vector.extract_strided_slice %235 {offsets = [13, 0], sizes = [1, 32], strides = [1, 1]} : vector<16x32xf32> to vector<1x32xf32>
    %c1_101 = arith.constant 1 : index
    %c160_102 = arith.constant 160 : index
    %263 = vector.load %arg7[%c1_101, %c160_102] : memref<2x256xf32, #tpu.memory_space<vmem>>, vector<1x32xf32>
    tpu.vector_store %arg7[%c1_101, %c160_102], %262 {strides = array<i32>} : memref<2x256xf32, #tpu.memory_space<vmem>>, vector<1x32xf32>,
    %264 = vector.extract_strided_slice %235 {offsets = [14, 0], sizes = [1, 32], strides = [1, 1]} : vector<16x32xf32> to vector<1x32xf32>
    %c1_103 = arith.constant 1 : index
    %c192_104 = arith.constant 192 : index
    %265 = vector.load %arg7[%c1_103, %c192_104] : memref<2x256xf32, #tpu.memory_space<vmem>>, vector<1x32xf32>
    tpu.vector_store %arg7[%c1_103, %c192_104], %264 {strides = array<i32>} : memref<2x256xf32, #tpu.memory_space<vmem>>, vector<1x32xf32>,
    %266 = vector.extract_strided_slice %235 {offsets = [15, 0], sizes = [1, 32], strides = [1, 1]} : vector<16x32xf32> to vector<1x32xf32>
    %c1_105 = arith.constant 1 : index
    %c224_106 = arith.constant 224 : index
    %267 = vector.load %arg7[%c1_105, %c224_106] : memref<2x256xf32, #tpu.memory_space<vmem>>, vector<1x32xf32>
    tpu.vector_store %arg7[%c1_105, %c224_106], %266 {strides = array<i32>} : memref<2x256xf32, #tpu.memory_space<vmem>>, vector<1x32xf32>,
    %c0_107 = arith.constant 0 : index
    %c0_108 = arith.constant 0 : index
    %268 = vector.load %arg7[%c0_107, %c0_108] : memref<2x256xf32, #tpu.memory_space<vmem>>, vector<2x256xf32>
    %c0_109 = arith.constant 0 : index
    %c0_110 = arith.constant 0 : index
    %269 = vector.load %arg5[%c0_109, %c0_110] : memref<256x128xf32, #tpu.memory_space<vmem>>, vector<256x128xf32>
    %cst_111 = arith.constant dense<0.000000e+00> : vector<2x128xf32>
    %270 = tpu.matmul %268, %269, %cst_111 {dimension_numbers = #tpu.dot_dimension_numbers<[1], [0], [0], [1], [0, 0, 1, 1], [], []>} : vector<2x256xf32>, vector<256x128xf32>, vector<2x128xf32> -> vector<2x128xf32>
    %271 = vector.extract_strided_slice %2 {offsets = [16, 0], sizes = [1, 128], strides = [1, 1]} : vector<20x128xf32> to vector<1x128xf32>
    %272 = vector.broadcast %271 : vector<1x128xf32> to vector<2x128xf32>
    %273 = arith.addf %270, %272 : vector<2x128xf32>
    %cst_112 = arith.constant 0.000000e+00 : f32
    %274 = vector.broadcast %cst_112 : f32 to vector<2x128xf32>
    %275 = arith.maximumf %273, %274 : vector<2x128xf32>
    %276 = vector.extract_strided_slice %2 {offsets = [18, 0], sizes = [2, 128], strides = [1, 1]} : vector<20x128xf32> to vector<2x128xf32>
    %cst_113 = arith.constant dense<0.000000e+00> : vector<2x2xf32>
    %277 = tpu.matmul %275, %276, %cst_113 {dimension_numbers = #tpu.dot_dimension_numbers<[1], [1], [0], [0], [0, 0, 1, 0], [], []>} : vector<2x128xf32>, vector<2x128xf32>, vector<2x2xf32> -> vector<2x2xf32>
    %278 = vector.extract_strided_slice %2 {offsets = [17, 0], sizes = [1, 2], strides = [1, 1]} : vector<20x128xf32> to vector<1x2xf32>
    %279 = vector.broadcast %278 : vector<1x2xf32> to vector<2x2xf32>
    %280 = arith.addf %277, %279 : vector<2x2xf32>
    %c0_114 = arith.constant 0 : index
    %c0_115 = arith.constant 0 : index
    %281 = vector.load %arg6[%c0_114, %c0_115] : memref<2x2xf32, #tpu.memory_space<vmem>>, vector<2x2xf32>
    tpu.vector_store %arg6[%c0_114, %c0_115], %280 {strides = array<i32>} : memref<2x2xf32, #tpu.memory_space<vmem>>, vector<2x2xf32>,
    return
  }
}

</mosaic_0001>

<bundles_post_ra>
// kernel: tpu_custom_call.1
= control target key start
LH: loop header
LB: loop body
LE: loop exit
PB: predicated region body
PF: predicated region fallthrough
CT: control target
= control target key end

     0   :  { %11 = vsyncpa [#allocation4], 0  ;;  %s2170_s0 = inlined_call_operand.hbm [shape: f32[16,32], index: 0, kind: input, shape index: {}]   ;;  %s2171_s1 = inlined_call_operand.hbm [shape: f32[16,16], index: 1, kind: input, shape index: {}]   ;;  %s2172_s2 = inlined_call_operand.hbm [shape: f32[32,256], index: 2, kind: input, shape index: {}]   ;;  %s2173_s3 = inlined_call_operand.hbm [shape: f32[9,32,32], index: 3, kind: input, shape index: {}]   ;;  %s2174_s4 = inlined_call_operand.hbm [shape: f32[20,128], index: 4, kind: input, shape index: {}]   ;;  %s2175_s5 = inlined_call_operand.hbm [shape: f32[256,128], index: 5, kind: input, shape index: {}]   ;;  %s2176_s6 = inlined_call_operand.hbm [shape: f32[2,2], index: 6, kind: output, shape index: {}]  }
   0x1   :  { %12 = vsyncpa [#allocation7], 0 }
   0x2   :  { %13 = vsyncpa [#allocation10], 0 }
   0x3   :  { %14 = vsyncpa [#allocation13], 0 }
   0x4   :  { %15 = vsyncpa [#allocation5], 0  ;;  %s33_s23 = sshll.u32 %s2171_s1, 4  ;;  %s1844_s24 = smov [#allocation6]   ;;  %s34_s23 = int_to_ptr.hbm [resolvable:$true] %s33_s23 }
   0x5   :  { %s35_s25 = sshll.u32 %s1844_s24, 4  ;;  %s59_s28 = sshll.u32 %s2173_s3, 4  ;;  %s36_s25 = int_to_ptr.vmem [resolvable:$true] %s35_s25  ;;  %s60_s28 = int_to_ptr.hbm [resolvable:$true] %s59_s28 }
   0x6   :  { %s1845_s29 = smov 128   ;;  %s1846_s30 = smov 8  }
   0x7   :  { %41 = dma.hbm_to_vmem [thread:$0]  %s34_s23, 256, %s36_s25, [#allocation7], %s1845_s29, %s1845_s29, %s1846_s30  }
   0x8   :  { %s1847_s7 = smov [#allocation9]   ;;  %s20_s1 = sshll.u32 %s2170_s0, 4  ;;  %s21_s1 = int_to_ptr.hbm [resolvable:$true] %s20_s1 }
   0x9   :  { %s61_s8 = sshll.u32 %s1847_s7, 4  ;;  %s46_s12 = sshll.u32 %s2172_s2, 4  ;;  %s62_s8 = int_to_ptr.vmem [resolvable:$true] %s61_s8  ;;  %s47_s12 = int_to_ptr.hbm [resolvable:$true] %s46_s12 }
   0xa   :  { %67 = dma.hbm_to_vmem [thread:$0]  %s60_s28, 4608, %s62_s8, [#allocation10], %s1845_s29, %s1845_s29, %s1846_s30  }
   0xb   :  { %s1848_s13 = smov [#allocation3]   ;;  %s1849_s15 = smov [#allocation8]  }
   0xc   :  { %s22_s14 = sshll.u32 %s1848_s13, 4  ;;  %s48_s0 = sshll.u32 %s1849_s15, 4  ;;  %s23_s14 = int_to_ptr.vmem [resolvable:$true] %s22_s14  ;;  %s49_s0 = int_to_ptr.vmem [resolvable:$true] %s48_s0 }
   0xd   :  { %28 = dma.hbm_to_vmem [thread:$0]  %s21_s1, 256, %s23_s14, [#allocation4], %s1845_s29, %s1845_s29, %s1846_s30  }
   0xe   :  { %s1850_s16 = smov 256   ;;  %s1851_s17 = smov 16  }
   0xf   :  { %54 = dma.hbm_to_vmem [thread:$0]  %s47_s12, 1024, %s49_s0, [#allocation7], %s1850_s16, %s1850_s16, %s1851_s17  }
  0x10   :  { %s72_s20 = sshll.u32 %s2174_s4, 4  ;;  %s1852_s2 = smov [#allocation11]   ;;  %s73_s20 = int_to_ptr.hbm [resolvable:$true] %s72_s20 }
  0x11   :  { %s74_s21 = sshll.u32 %s1852_s2, 4  ;;  %s85_s24 = sshll.u32 %s2175_s5, 4  ;;  %s75_s21 = int_to_ptr.vmem [resolvable:$true] %s74_s21  ;;  %s86_s24 = int_to_ptr.hbm [resolvable:$true] %s85_s24 }
  0x12   :  { %80 = dma.hbm_to_vmem [thread:$0]  %s73_s20, 384, %s75_s21, [#allocation10], %s1845_s29, %s1845_s29, %s1846_s30  }
  0x13   :  { %s1853_s25 = smov [#allocation12]  }
  0x14   :  { %s87_s26 = sshll.u32 %s1853_s25, 4  ;;  %s88_s26 = int_to_ptr.vmem [resolvable:$true] %s87_s26 }
  0x15   :  { %93 = dma.hbm_to_vmem [thread:$0]  %s86_s24, 4096, %s88_s26, [#allocation13], %s1845_s29, %s1845_s29, %s1846_s30  }
  0x16   :  { %1834 = dma.done.wait [#allocation4], 256  }
  0x17   :  { %1835 = vsyncadd [#allocation4], 4294967040 }
  0x18   :  { %1836 = dma.done.wait [#allocation7], 1280  }
  0x19   :  { %1837 = vsyncadd [#allocation7], 4294966016 }
  0x1a   :  { %1838 = dma.done.wait [#allocation10], 4992  }
  0x1b   :  { %1839 = vsyncadd [#allocation10], 4294962304 }
  0x1c   :  { %1840 = dma.done.wait [#allocation13], 4096  }
  0x1d   :  { %1841 = vsyncadd [#allocation13], 4294963200  ;;  %vm149_vm0 = vcmask 261120   ;;  %v1928_v0 = vld [vmem:[#allocation3 + $0x8] sm:$0xff]  ;;  %v1932_v2 = vld [vmem:[#allocation3] sm:$0xff]  ;;  %v1854_v4 = vmov 32.0   ;;  %v137_v34 = vlaneseq }
  0x1e   :  { %v182_v1 = vsel %vm149_vm0, %v1928_v0, 0.0  ;;  %v179_v3 = vsel %vm149_vm0, %v1932_v2, 0.0  ;;  %1620 = vrcp.f32 %v1854_v4  ;;  %v126_v9 = vld [vmem:[#allocation8 + $0x30] sm:$0xff]  ;;  %v124_v10 = vld [vmem:[#allocation8 + $0x20] sm:$0xff]  ;;  %v1855_v48 = vmov 0.0   ;;  %s1856_s4 = smov 64  }
  0x1f   :  { %183 = vadd.xlane.f32.xlu0 %v182_v1  ;;  %1573 = vmatpush.msra.mxu3 %v126_v9  ;;  %v122_v12 = vld [vmem:[#allocation8 + $0x10] sm:$0xff]  ;;  %v120_v13 = vld [vmem:[#allocation8] sm:$0xff]  ;;  %v138_v39 = vshrl.u32 %v137_v34, 7  ;;  %v141_v40 = vand.u32 127, %v137_v34  ;;  %vm261_vm8 = vcmask 130048   ;;  %s1857_s5 = smov 96  }
  0x20   :  { %168 = vmatpush.msra.mxu0 %v126_v9  ;;  %v1960_v1 = vld [vmem:[#allocation11] sm:$0xff]  ;;  %s1858_s27 = smov 32   ;;  %s1859_s28 = smov [#allocation14]  }
  0x21   :  { %1574 = vmatpush.msra.mxu3 %v124_v10  ;;  %v139_v43 = vadd.s32 8, %v138_v39  ;;  %vm142_vm3 = vcmp.eq.s32.totalorder %v138_v39, %v141_v40  ;;  %v148_v4 = vperm.slane %v1960_v1, 0  ;;  %s1498_s29 = sshll.u32 %s1859_s28, 4  ;;  %s1500_s8 = sshll.u32 %s2176_s6, 4  ;;  %s1499_s29 = int_to_ptr.vmem [resolvable:$true] %s1498_s29  ;;  %s1501_s8 = int_to_ptr.hbm [resolvable:$true] %s1500_s8 }
  0x22   :  { %169 = vmatpush.msra.mxu0 %v124_v10  ;;  %v1952_v49 = vsel %vm142_vm3, 1.0, %v1855_v48 }
  0x23   :  { %1575 = vmatpush.msra.mxu3 %v122_v12  ;;  %vm143_vm4 = vcmp.eq.s32.totalorder %v139_v43, %v141_v40  ;;  %v1980_v43 = vld [vmem:[#allocation6 + $0x8] sm:$0xff] }
  0x24   :  { %v1621_v5 = vpop.eup %1620  ;;  %170 = vmatpush.msra.mxu0 %v122_v12  ;;  %v1954_v53 = vsel %vm143_vm4, 1.0, %v1855_v48 }
  0x25   :  { %v186_v6 = vmul.f32 32.0, %v1621_v5  ;;  %vm190_vm1 = vweird.f32 %v1621_v5  ;;  %1576 = vmatpush.msra.mxu3 %v120_v13 }
  0x26   :  { %171 = vmatpush.msra.mxu0 %v120_v13  ;;  %1516 = vmatmul.msk.f32.vlgmr.msra.gmra.mxu3 %vm149_vm0, %v1928_v0 }
  0x27   :  { %180 = vadd.xlane.f32.xlu0 %v179_v3  ;;  %v187_v7 = vsub.f32 1.0, %v186_v6  ;;  %1515 = vmatmul.msk.f32.vlgmr.msra.gmra.mxu0 %vm149_vm0, %v1932_v2 }
  0x29   :  { %v188_v8 = vmul.f32 %v1621_v5, %v187_v7 }
  0x2b   :  { %v189_v11 = vadd.f32 %v1621_v5, %v188_v8 }
  0x2d   :  { %v1936_v14 = vsel %vm190_vm1, %v1621_v5, %v189_v11 }
  0x92   :  { %v184_v15 = vpop.xlane.xlu0 %183 }
  0x93   :  { %v193_v16 = vmul.f32 %v1936_v14, %v184_v15 }
  0x95   :  { %v195_v17 = vsub.f32 %v1928_v0, %v193_v16 }
  0x97   :  { %1517 = vmatpush.xpose.msk.msra.mxu1 %vm149_vm0, %v195_v17  ;;  %v226_v23 = vmul.f32 %v195_v17, %v195_v17 }
  0x99   :  { %v230_v24 = vsel %vm149_vm0, %v226_v23, 0.0 }
  0x9a   :  { %v181_v18 = vpop.xlane.xlu0 %180 }
  0x9b   :  { %v192_v19 = vmul.f32 %v1936_v14, %v181_v18 }
  0x9d   :  { %v194_v20 = vsub.f32 %v1932_v2, %v192_v19 }
  0x9f   :  { %1518 = vmatpush.xpose.msk.msra.mxu1 %vm149_vm0, %v194_v20  ;;  %v225_v21 = vmul.f32 %v194_v20, %v194_v20 }
  0xa1   :  { %v227_v22 = vsel %vm149_vm0, %v225_v21, 0.0 }
  0xa2   :  { %228 = vadd.xlane.f32.xlu1 %v227_v22  ;;  %1519 = vmatmul.msk.f32.vlgmr.msra.gmra.mxu1 %vm149_vm0, %v194_v20 }
  0xa4   :  { %v173_v8 = vpop.f32.mrf.mxu0 }
  0xa5   :  { %v1967_v9 = vadd.f32 %v173_v8, %v148_v4 }
  0xa9   :  { %v176_v3 = vpop.f32.mrf.mxu3 }
  0xaa   :  { %231 = vadd.xlane.f32.xlu1 %v230_v24  ;;  %1520 = vmatmul.msk.f32.gmra.mxu1 %vm149_vm0, %v195_v17  ;;  %v1963_v6 = vadd.f32 %v176_v3, %v148_v4 }
  0xac   :  { %452 = vrot.lane.b32.xlu0 %v1963_v6, %s1856_s4  ;;  %374 = vmatpush.msra.mxu2 %v1963_v6  ;;  %v1595_v16 = vpack.i.bf16 %v1967_v9, %v1963_v6 }
  0xae   :  { %375 = vmatpush.msra.mxu2 %v1967_v9 }
  0xb4   :  { %448 = vrot.lane.b32.xlu0 %v1963_v6, %s1857_s5 }
  0xc3   :  { %450 = vrot.lane.b32.xlu1 %v1967_v9, %s1856_s4 }
 0x115   :  { %v229_v25 = vpop.xlane.xlu1 %228 }
 0x116   :  { %v233_v26 = vmul.f32 0.032258064, %v229_v25 }
 0x118   :  { %1622 = vrsqrt.f32 %v233_v26  ;;  %vm242_vm2 = vcmp.eq.f32.partialorder %v233_v26, inf  ;;  %v245_v46 = vand.u32 2147483648, %v233_v26  ;;  %vm244_vm5 = vcmp.eq.f32.partialorder %v233_v26, 0.0 }
 0x11d   :  { %v232_v27 = vpop.xlane.xlu1 %231 }
 0x11e   :  { %v1623_v28 = vpop.eup %1622  ;;  %v234_v29 = vmul.f32 0.032258064, %v232_v27 }
 0x11f   :  { %v236_v30 = vmul.f32 %v1623_v28, %v233_v26  ;;  %v219_v20 = vpop.f32.mrf.mxu1 }
 0x120   :  { %1624 = vrsqrt.f32 %v234_v29  ;;  %vm254_vm6 = vcmp.eq.f32.partialorder %v234_v29, inf  ;;  %v257_v52 = vand.u32 2147483648, %v234_v29  ;;  %vm256_vm7 = vcmp.eq.f32.partialorder %v234_v29, 0.0 }
 0x121   :  { %v237_v31 = vmul.f32 %v1623_v28, %v236_v30 }
 0x123   :  { %v238_v32 = vmul.f32 0.5, %v237_v31 }
 0x125   :  { %v239_v33 = vsub.f32 1.5, %v238_v32 }
 0x126   :  { %v1625_v35 = vpop.eup %1624 }
 0x127   :  { %v248_v36 = vmul.f32 %v1625_v35, %v234_v29  ;;  %v240_v37 = vmul.f32 %v1623_v28, %v239_v33  ;;  %v222_v40 = vpop.f32.mrf.mxu1 }
 0x129   :  { %v249_v38 = vmul.f32 %v1625_v35, %v248_v36  ;;  %v241_v41 = vmul.f32 %v240_v37, %v233_v26 }
 0x12b   :  { %v250_v42 = vmul.f32 0.5, %v249_v38  ;;  %v243_v45 = vsel %vm242_vm2, %v233_v26, %v241_v41 }
 0x12c   :  { %v246_v50 = vsel %vm244_vm5, %v245_v46, %v243_v45 }
 0x12d   :  { %v251_v44 = vsub.f32 1.5, %v250_v42  ;;  %v259_v55 = vmul.f32 %v1952_v49, %v246_v50 }
 0x12f   :  { %v252_v47 = vmul.f32 %v1625_v35, %v251_v44  ;;  %v262_v58 = vsel %vm261_vm8, %v259_v55, 0.0  ;;  %v1977_v35 = vld [vmem:[#allocation6] sm:$0xff] }
 0x131   :  { %v253_v51 = vmul.f32 %v252_v47, %v234_v29 }
 0x133   :  { %v255_v54 = vsel %vm254_vm6, %v234_v29, %v253_v51 }
 0x134   :  { %v258_v56 = vsel %vm256_vm7, %v257_v52, %v255_v54 }
 0x135   :  { %v260_v57 = vmul.f32 %v1954_v53, %v258_v56  ;;  %v451_v51 = vpop.permute.xlu1 %450 }
 0x137   :  { %v263_v59 = vsel %vm261_vm8, %v260_v57, 0.0 }
 0x138   :  { %v264_v60 = vadd.f32 %v263_v59, %v262_v58 }
 0x13a   :  { %v265_v61 = vrot.slane %v264_v60, 4 }
 0x13c   :  { %v266_v62 = vadd.f32 %v265_v61, %v264_v60 }
 0x13e   :  { %v267_v63 = vrot.slane %v266_v62, 2 }
 0x140   :  { %v268_v5 = vadd.f32 %v267_v63, %v266_v62 }
 0x142   :  { %v269_v7 = vrot.slane %v268_v5, 1 }
 0x144   :  { %v270_v10 = vadd.f32 %v269_v7, %v268_v5 }
 0x146   :  { %v271_v11 = vmul.f32 %v270_v10, %v246_v50  ;;  %v272_v12 = vmul.f32 %v270_v10, %v258_v56  ;;  %v453_v50 = vpop.permute.xlu0 %452 }
 0x147   :  { %1527 = vmatpush.xpose.msk.msrb.mxu0 %vm149_vm0, %v453_v50 }
 0x148   :  { %v273_v13 = vadd.f32 1e-08, %v271_v11  ;;  %v274_v15 = vadd.f32 1e-08, %v272_v12 }
 0x14a   :  { %1626 = vrcp.f32 %v273_v13  ;;  %v286_v23 = vand.u32 2147483648, %v273_v13  ;;  %v284_v26 = vand.u32 2147483647, %v273_v13  ;;  %v301_v27 = vand.u32 2147483648, %v274_v15 }
 0x14b   :  { %1628 = vrcp.f32 %v274_v15  ;;  %v299_v29 = vand.u32 2147483647, %v274_v15  ;;  %vm280_vm11 = vweird.f32 %v273_v13  ;;  %vm295_vm13 = vweird.f32 %v274_v15  ;;  %1528 = vmatpush.xpose.msk.msrb.mxu0 %vm149_vm0, %v451_v51 }
 0x14c   :  { %v287_v31 = vor.u32 1.1754944e-38, %v286_v23  ;;  %vm285_vm14 = vcmp.eq.f32.partialorder %v284_v26, 8.507059e+37  ;;  %v302_v34 = vor.u32 1.1754944e-38, %v301_v27 }
 0x14d   :  { %vm300_vm1 = vcmp.eq.f32.partialorder %v299_v29, 8.507059e+37 }
 0x14e   :  { %v449_v10 = vpop.permute.xlu0 %448 }
 0x150   :  { %v1627_v17 = vpop.eup %1626 }
 0x151   :  { %v1629_v18 = vpop.eup %1628  ;;  %v276_v19 = vmul.f32 %v1627_v17, %v273_v13  ;;  %vm281_vm9 = vweird.f32 %v1627_v17 }
 0x152   :  { %v291_v21 = vmul.f32 %v1629_v18, %v274_v15  ;;  %vm296_vm10 = vweird.f32 %v1629_v18  ;;  %vm282_vm12 = vmor %vm280_vm11, %vm281_vm9 }
 0x153   :  { %v277_v22 = vsub.f32 1.0, %v276_v19  ;;  %vm297_vm15 = vmor %vm295_vm13, %vm296_vm10 }
 0x154   :  { %v292_v24 = vsub.f32 1.0, %v291_v21 }
 0x155   :  { %v278_v25 = vmul.f32 %v1627_v17, %v277_v22 }
 0x156   :  { %v293_v28 = vmul.f32 %v1629_v18, %v292_v24 }
 0x157   :  { %v279_v30 = vadd.f32 %v1627_v17, %v278_v25 }
 0x158   :  { %v294_v32 = vadd.f32 %v1629_v18, %v293_v28 }
 0x159   :  { %v283_v33 = vsel %vm282_vm12, %v1627_v17, %v279_v30  ;;  %v387_v30 = vld [vmem:[#allocation9 + $0x10] sm:$0xff] }
 0x15a   :  { %v288_v36 = vsel %vm285_vm14, %v287_v31, %v283_v33  ;;  %v298_v37 = vsel %vm297_vm15, %v1629_v18, %v294_v32  ;;  %v133_v31 = vsub.f32 1.0, %v1977_v35 }
 0x15b   :  { %v289_v38 = vmul.f32 %v288_v36, %v219_v20  ;;  %v303_v39 = vsel %vm300_vm1, %v302_v34, %v298_v37  ;;  %v134_v36 = vsub.f32 1.0, %v1980_v43 }
 0x15c   :  { %v304_v42 = vmul.f32 %v303_v39, %v222_v40  ;;  %v2000_v32 = vmul.f32 -1e+30, %v133_v31  ;;  %v386_v39 = vld [vmem:[#allocation9 + $0x8] sm:$0xff]  ;;  %v385_v40 = vld [vmem:[#allocation9] sm:$0xff] }
 0x15d   :  { %v305_v41 = vmul.f32 %v289_v38, %v1977_v35 }
 0x15e   :  { %v306_v45 = vmul.f32 %v304_v42, %v1980_v43 }
 0x15f   :  { %v307_v44 = vadd.f32 %v1952_v49, %v305_v41  ;;  %v2005_v41 = vmul.f32 -1e+30, %v134_v36  ;;  %v747_v36 = vld [vmem:[#allocation9 + $0x60] sm:$0xff] }
 0x160   :  { %v308_v47 = vadd.f32 %v1954_v53, %v306_v45 }
 0x161   :  { %v309_v46 = vsel %vm261_vm8, %v307_v44, 0.0 }
 0x162   :  { %310 = vadd.xlane.f32.xlu2 %v309_v46  ;;  %v312_v48 = vsel %vm261_vm8, %v308_v47, 0.0 }
 0x16a   :  { %313 = vadd.xlane.f32.xlu2 %v312_v48 }
 0x182   :  { %446 = vrot.lane.b32.xlu2 %v1967_v9, %s1857_s5 }
 0x1d5   :  { %v311_v52 = vpop.xlane.xlu2 %310 }
 0x1d6   :  { %vm315_vm2 = vcmp.gt.f32.partialorder %v311_v52, 0.0 }
 0x1d7   :  { %v317_v54 = vsel %vm315_vm2, %v311_v52, 1.0 }
 0x1d8   :  { %1630 = vrsqrt.f32 %v317_v54  ;;  %vm325_vm5 = vweird.f32 %v317_v54 }
 0x1dd   :  { %v314_v55 = vpop.xlane.xlu2 %313 }
 0x1de   :  { %v1631_v56 = vpop.eup %1630  ;;  %vm316_vm3 = vcmp.gt.f32.partialorder %v314_v55, 0.0 }
 0x1df   :  { %v320_v57 = vmul.f32 %v1631_v56, %v317_v54  ;;  %v318_v58 = vsel %vm316_vm3, %v314_v55, 1.0  ;;  %vm326_vm4 = vweird.f32 %v1631_v56 }
 0x1e0   :  { %1632 = vrsqrt.f32 %v318_v58  ;;  %vm327_vm6 = vmor %vm325_vm5, %vm326_vm4  ;;  %vm335_vm9 = vweird.f32 %v318_v58 }
 0x1e1   :  { %v321_v59 = vmul.f32 %v1631_v56, %v320_v57 }
 0x1e3   :  { %v322_v60 = vmul.f32 0.5, %v321_v59 }
 0x1e5   :  { %v323_v61 = vsub.f32 1.5, %v322_v60  ;;  %v447_v62 = vpop.permute.xlu2 %446 }
 0x1e6   :  { %v1633_v63 = vpop.eup %1632  ;;  %1529 = vmatmul.msk.f32.vlgmr.msrb.gmra.mxu0 %vm149_vm0, %v447_v62  ;;  %v389_v62 = vperm.slane %v1960_v1, 1 }
 0x1e7   :  { %v330_v3 = vmul.f32 %v1633_v63, %v318_v58  ;;  %v324_v4 = vmul.f32 %v1631_v56, %v323_v61  ;;  %vm336_vm7 = vweird.f32 %v1633_v63 }
 0x1e8   :  { %vm337_vm10 = vmor %vm335_vm9, %vm336_vm7 }
 0x1e9   :  { %v331_v5 = vmul.f32 %v1633_v63, %v330_v3  ;;  %v328_v11 = vsel %vm327_vm6, %v1631_v56, %v324_v4 }
 0x1ea   :  { %v339_v13 = vmul.f32 %v1952_v49, %v328_v11  ;;  %v350_v27 = vmul.f32 %v328_v11, %v307_v44 }
 0x1eb   :  { %v332_v7 = vmul.f32 0.5, %v331_v5  ;;  %v750_v5 = vld [vmem:[#allocation9 + $0x78] sm:$0xff] }
 0x1ec   :  { %v341_v19 = vsel %vm261_vm8, %v339_v13, 0.0  ;;  %780 = vmatpush.msra.mxu0 %v750_v5 }
 0x1ed   :  { %v333_v8 = vsub.f32 1.5, %v332_v7  ;;  %v749_v7 = vld [vmem:[#allocation9 + $0x70] sm:$0xff] }
 0x1ee   :  { %1530 = vmatmul.msk.f32.gmra.mxu0 %vm149_vm0, %v449_v10 }
 0x1ef   :  { %v334_v12 = vmul.f32 %v1633_v63, %v333_v8  ;;  %781 = vmatpush.msra.mxu0 %v749_v7 }
 0x1f1   :  { %v338_v15 = vsel %vm337_vm10, %v1633_v63, %v334_v12 }
 0x1f2   :  { %v340_v17 = vmul.f32 %v1954_v53, %v338_v15  ;;  %v351_v29 = vmul.f32 %v338_v15, %v308_v47  ;;  %v388_v53 = vld [vmem:[#allocation9 + $0x18] sm:$0xff] }
 0x1f3   :  { %408 = vmatpush.msrb.mxu3 %v388_v53 }
 0x1f4   :  { %v342_v18 = vsel %vm261_vm8, %v340_v17, 0.0 }
 0x1f5   :  { %v343_v20 = vadd.f32 %v342_v18, %v341_v19  ;;  %409 = vmatpush.msrb.mxu3 %v387_v30 }
 0x1f7   :  { %v344_v21 = vrot.slane %v343_v20, 4  ;;  %410 = vmatpush.msrb.mxu3 %v386_v39 }
 0x1f9   :  { %v345_v22 = vadd.f32 %v344_v21, %v343_v20  ;;  %411 = vmatpush.msrb.mxu3 %v385_v40 }
 0x1fb   :  { %v346_v23 = vrot.slane %v345_v22, 2 }
 0x1fd   :  { %v347_v24 = vadd.f32 %v346_v23, %v345_v22 }
 0x1ff   :  { %v348_v25 = vrot.slane %v347_v24, 1 }
 0x201   :  { %v349_v26 = vadd.f32 %v348_v25, %v347_v24 }
 0x203   :  { %v352_v28 = vmul.f32 %v350_v27, %v349_v26  ;;  %v353_v49 = vmul.f32 %v351_v29, %v349_v26 }
 0x205   :  { %1521 = vmatmul.msk.f32.vlgmr.msra.gmra.mxu2 %vm261_vm8, %v352_v28 }
 0x20d   :  { %1522 = vmatmul.msk.f32.gmra.mxu2 %vm261_vm8, %v353_v49 }
 0x263   :  { %v479_v33 = vpop.f32.mrf.mxu0 }
 0x264   :  { %v485_v34 = vmul.f32 0.17677669, %v479_v33 }
 0x266   :  { %v487_v37 = vadd.f32 %v485_v34, %v2000_v32  ;;  %v748_v34 = vld [vmem:[#allocation9 + $0x68] sm:$0xff] }
 0x267   :  { %782 = vmatpush.msra.mxu0 %v748_v34 }
 0x268   :  { %v489_v38 = vsel %vm261_vm8, %v487_v37, -inf }
 0x269   :  { %490 = vmax.xlane.f32.xlu2 %v489_v38  ;;  %783 = vmatpush.msra.mxu0 %v747_v36 }
 0x26b   :  { %v482_v42 = vpop.f32.mrf.mxu0 }
 0x26c   :  { %v486_v44 = vmul.f32 0.17677669, %v482_v42 }
 0x26e   :  { %v488_v35 = vadd.f32 %v486_v44, %v2005_v41 }
 0x270   :  { %v492_v45 = vsel %vm261_vm8, %v488_v35, -inf }
 0x271   :  { %493 = vmax.xlane.f32.xlu1 %v492_v45 }
 0x288   :  { %v377_v46 = vpop.f32.mrf.mxu2 }
 0x289   :  { %v383_v43 = vmax.f32 %v377_v46, 0.0 }
 0x28a   :  { %1596 = vrot.lane.b32.xlu1 %v1595_v16, %s1858_s27 }
 0x28b   :  { %1523 = vmatmul.msk.f32.vlgmr.msrb.gmra.mxu3 %vm149_vm0, %v383_v43 }
 0x290   :  { %v380_v47 = vpop.f32.mrf.mxu2 }
 0x291   :  { %v384_v48 = vmax.f32 %v380_v47, 0.0 }
 0x293   :  { %1524 = vmatmul.msk.f32.gmra.mxu3 %vm149_vm0, %v384_v48 }
 0x2dc   :  { %v491_v50 = vpop.xlane.xlu2 %490 }
 0x2dd   :  { %v495_v51 = vsub.f32 %v487_v37, %v491_v50 }
 0x2df   :  { %v497_v52 = vmul.f32 1.442695, %v495_v51 }
 0x2e1   :  { %1634 = vpow2.f32 %v497_v52 }
 0x2e4   :  { %v494_v54 = vpop.xlane.xlu1 %493 }
 0x2e5   :  { %v496_v55 = vsub.f32 %v488_v35, %v494_v54 }
 0x2e7   :  { %v1635_v56 = vpop.eup %1634  ;;  %v499_v57 = vmul.f32 1.442695, %v496_v55 }
 0x2e8   :  { %v501_v58 = vsel %vm261_vm8, %v1635_v56, 0.0 }
 0x2e9   :  { %1636 = vpow2.f32 %v499_v57  ;;  %502 = vadd.xlane.f32.xlu0 %v501_v58  ;;  %v625_v58 = vld [vmem:[#allocation9 + $0x30] sm:$0xff] }
 0x2ef   :  { %v1637_v6 = vpop.eup %1636 }
 0x2f0   :  { %v504_v9 = vsel %vm261_vm8, %v1637_v6, 0.0 }
 0x2f1   :  { %505 = vadd.xlane.f32.xlu2 %v504_v9  ;;  %v623_v9 = vld [vmem:[#allocation9 + $0x20] sm:$0xff] }
 0x2fc   :  { %v1597_v16 = vpop.permute.xlu1 %1596 }
 0x2fd   :  { %v1598_v59 = vunpack.i.l.bf16 %v1597_v16  ;;  %v1599_v60 = vunpack.i.h.bf16 %v1597_v16 }
 0x2ff   :  { %563 = vmatpush.msrb.mxu1 %v1598_v59 }
 0x301   :  { %564 = vmatpush.msrb.mxu1 %v1599_v60 }
 0x30e   :  { %v413_v61 = vpop.f32.mrf.mxu3 }
 0x30f   :  { %v414_v4 = vadd.f32 %v413_v61, %v389_v62 }
 0x316   :  { %v416_v63 = vpop.f32.mrf.mxu3 }
 0x317   :  { %v417_v3 = vadd.f32 %v416_v63, %v389_v62  ;;  %v663_v62 = vld [vmem:[#allocation9 + $0x58] sm:$0xff] }
 0x319   :  { %433 = vmatpush.msrb.mxu2 %v417_v3 }
 0x31b   :  { %434 = vmatpush.msrb.mxu2 %v414_v4 }
 0x31c   :  { %1525 = vmatmul.msk.f32.vlgmr.msrb.gmra.mxu2 %vm261_vm8, %v352_v28 }
 0x31d   :  { %1577 = vmatpush.msra.mxu2 %v1598_v59 }
 0x31f   :  { %1578 = vmatpush.msra.mxu2 %v1599_v60 }
 0x321   :  { %683 = vmatpush.msrb.mxu2 %v663_v62  ;;  %v123_v62 = vld [vmem:[#allocation8 + $0x18] sm:$0xff] }
 0x324   :  { %1526 = vmatmul.msk.f32.gmra.mxu2 %vm261_vm8, %v353_v49 }
 0x35c   :  { %v503_v8 = vpop.xlane.xlu0 %502 }
 0x35d   :  { %1638 = vrcp.f32 %v503_v8  ;;  %v518_v15 = vand.u32 2147483648, %v503_v8  ;;  %v516_v18 = vand.u32 2147483647, %v503_v8  ;;  %vm512_vm12 = vweird.f32 %v503_v8 }
 0x35f   :  { %v519_v21 = vor.u32 1.1754944e-38, %v518_v15  ;;  %vm517_vm14 = vcmp.eq.f32.partialorder %v516_v18, 8.507059e+37 }
 0x363   :  { %v1639_v10 = vpop.eup %1638 }
 0x364   :  { %v508_v11 = vmul.f32 %v1639_v10, %v503_v8  ;;  %v506_v12 = vpop.xlane.xlu2 %505  ;;  %vm513_vm11 = vweird.f32 %v1639_v10 }
 0x365   :  { %1640 = vrcp.f32 %v506_v12  ;;  %vm514_vm13 = vmor %vm512_vm12, %vm513_vm11  ;;  %v533_v27 = vand.u32 2147483648, %v506_v12  ;;  %v531_v29 = vand.u32 2147483647, %v506_v12  ;;  %vm527_vm1 = vweird.f32 %v506_v12 }
 0x366   :  { %v509_v13 = vsub.f32 1.0, %v508_v11 }
 0x367   :  { %v534_v53 = vor.u32 1.1754944e-38, %v533_v27  ;;  %vm532_vm3 = vcmp.eq.f32.partialorder %v531_v29, 8.507059e+37 }
 0x368   :  { %v510_v17 = vmul.f32 %v1639_v10, %v509_v13 }
 0x36a   :  { %v511_v19 = vadd.f32 %v1639_v10, %v510_v17  ;;  %v619_v17 = vperm.slane %v1960_v1, 5 }
 0x36b   :  { %v1641_v20 = vpop.eup %1640 }
 0x36c   :  { %v523_v22 = vmul.f32 %v1641_v20, %v506_v12  ;;  %v515_v23 = vsel %vm514_vm13, %v1639_v10, %v511_v19  ;;  %vm528_vm15 = vweird.f32 %v1641_v20  ;;  %v616_v12 = vperm.slane %v1960_v1, 4 }
 0x36d   :  { %v520_v24 = vsel %vm517_vm14, %v519_v21, %v515_v23  ;;  %vm529_vm2 = vmor %vm527_vm1, %vm528_vm15 }
 0x36e   :  { %v524_v25 = vsub.f32 1.0, %v523_v22  ;;  %v521_v26 = vmul.f32 %v1635_v56, %v520_v24 }
 0x370   :  { %v525_v28 = vmul.f32 %v1641_v20, %v524_v25  ;;  %1531 = vmatmul.msk.f32.vlgmr.msrb.gmra.mxu1 %vm261_vm8, %v521_v26 }
 0x372   :  { %v526_v49 = vadd.f32 %v1641_v20, %v525_v28 }
 0x374   :  { %v530_v30 = vsel %vm529_vm2, %v1641_v20, %v526_v49  ;;  %v662_v49 = vld [vmem:[#allocation9 + $0x50] sm:$0xff] }
 0x375   :  { %v535_v31 = vsel %vm532_vm3, %v534_v53, %v530_v30  ;;  %684 = vmatpush.msrb.mxu2 %v662_v49  ;;  %v661_v53 = vld [vmem:[#allocation9 + $0x48] sm:$0xff]  ;;  %v660_v30 = vld [vmem:[#allocation9 + $0x40] sm:$0xff] }
 0x376   :  { %v536_v33 = vmul.f32 %v1637_v6, %v535_v31  ;;  %v624_v6 = vld [vmem:[#allocation9 + $0x28] sm:$0xff]  ;;  %v627_v31 = vperm.slane %v1960_v1, 2 }
 0x377   :  { %685 = vmatpush.msrb.mxu2 %v661_v53 }
 0x378   :  { %1532 = vmatmul.msk.f32.vlgmr.msra.gmra.mxu2 %vm261_vm8, %v536_v33 }
 0x379   :  { %686 = vmatpush.msrb.mxu2 %v660_v30 }
 0x39f   :  { %v2022_v37 = vpop.f32.mrf.mxu2 }
 0x3a0   :  { %v442_v38 = vmax.f32 %v2022_v37, 0.0 }
 0x3a2   :  { %1537 = vmatmul.msk.f32.vlgmr.msra.gmra.mxu0 %vm149_vm0, %v442_v38 }
 0x3a7   :  { %v2028_v39 = vpop.f32.mrf.mxu2 }
 0x3a8   :  { %v443_v40 = vmax.f32 %v2028_v39, 0.0 }
 0x3aa   :  { %1538 = vmatmul.msk.f32.gmra.mxu0 %vm149_vm0, %v443_v40 }
 0x3ed   :  { %v566_v42 = vpop.f32.mrf.mxu1 }
 0x3ee   :  { %v567_v44 = vadd.f32 %v566_v42, %v1932_v2 }
 0x3f0   :  { %v572_v35 = vsel %vm149_vm0, %v567_v44, 0.0 }
 0x3f1   :  { %573 = vadd.xlane.f32.xlu0 %v572_v35 }
 0x3fb   :  { %v569_v45 = vpop.f32.mrf.mxu2 }
 0x3fc   :  { %v570_v46 = vadd.f32 %v569_v45, %v1928_v0  ;;  %v626_v0 = vld [vmem:[#allocation9 + $0x38] sm:$0xff]  ;;  %v664_v45 = vperm.slane %v1960_v1, 3 }
 0x3fd   :  { %646 = vmatpush.msra.mxu3 %v626_v0 }
 0x3fe   :  { %v575_v43 = vsel %vm149_vm0, %v570_v46, 0.0 }
 0x3ff   :  { %576 = vadd.xlane.f32.xlu2 %v575_v43  ;;  %647 = vmatpush.msra.mxu3 %v625_v58 }
 0x401   :  { %648 = vmatpush.msra.mxu3 %v624_v6 }
 0x403   :  { %649 = vmatpush.msra.mxu3 %v623_v9 }
 0x464   :  { %v574_v47 = vpop.xlane.xlu0 %573 }
 0x465   :  { %v578_v48 = vmul.f32 %v574_v47, %v1936_v14 }
 0x467   :  { %v580_v50 = vsub.f32 %v567_v44, %v578_v48 }
 0x469   :  { %v582_v51 = vmul.f32 %v580_v50, %v580_v50 }
 0x46b   :  { %v584_v52 = vsel %vm149_vm0, %v582_v51, 0.0 }
 0x46c   :  { %585 = vadd.xlane.f32.xlu0 %v584_v52 }
 0x472   :  { %v577_v54 = vpop.xlane.xlu2 %576 }
 0x473   :  { %v579_v2 = vmul.f32 %v577_v54, %v1936_v14 }
 0x475   :  { %v581_v55 = vsub.f32 %v570_v46, %v579_v2 }
 0x477   :  { %v583_v56 = vmul.f32 %v581_v55, %v581_v55 }
 0x479   :  { %v587_v57 = vsel %vm149_vm0, %v583_v56, 0.0 }
 0x47a   :  { %588 = vadd.xlane.f32.xlu2 %v587_v57 }
 0x4df   :  { %v586_v16 = vpop.xlane.xlu0 %585 }
 0x4e0   :  { %v590_v59 = vmul.f32 %v586_v16, %v1936_v14 }
 0x4e2   :  { %v592_v60 = vadd.f32 1e-05, %v590_v59 }
 0x4e4   :  { %1642 = vrsqrt.f32 %v592_v60  ;;  %vm600_vm5 = vweird.f32 %v592_v60 }
 0x4ea   :  { %v1643_v61 = vpop.eup %1642 }
 0x4eb   :  { %v595_v63 = vmul.f32 %v1643_v61, %v592_v60  ;;  %vm601_vm4 = vweird.f32 %v1643_v61  ;;  %v2058_v60 = vld [vmem:[#allocation8 + $0x38] sm:$0xff] }
 0x4ec   :  { %vm602_vm6 = vmor %vm600_vm5, %vm601_vm4  ;;  %810 = vmatpush.msra.mxu1 %v2058_v60 }
 0x4ed   :  { %v596_v3 = vmul.f32 %v1643_v61, %v595_v63  ;;  %v589_v4 = vpop.xlane.xlu2 %588  ;;  %v121_v63 = vld [vmem:[#allocation8 + $0x8] sm:$0xff] }
 0x4ee   :  { %v591_v5 = vmul.f32 %v589_v4, %v1936_v14 }
 0x4ef   :  { %v597_v7 = vmul.f32 0.5, %v596_v3 }
 0x4f0   :  { %v593_v8 = vadd.f32 1e-05, %v591_v5 }
 0x4f1   :  { %v598_v10 = vsub.f32 1.5, %v597_v7 }
 0x4f2   :  { %1644 = vrsqrt.f32 %v593_v8  ;;  %vm610_vm9 = vweird.f32 %v593_v8 }
 0x4f3   :  { %v599_v11 = vmul.f32 %v1643_v61, %v598_v10 }
 0x4f5   :  { %v603_v13 = vsel %vm602_vm6, %v1643_v61, %v599_v11  ;;  %v2061_v61 = vld [vmem:[#allocation8 + $0x28] sm:$0xff] }
 0x4f6   :  { %v614_v15 = vmul.f32 %v603_v13, %v580_v50  ;;  %811 = vmatpush.msra.mxu1 %v2061_v61  ;;  %v1605_v7 = vpack.i.bf16 %v2061_v61, %v2058_v60 }
 0x4f8   :  { %v1645_v18 = vpop.eup %1644  ;;  %v617_v19 = vmul.f32 %v616_v12, %v614_v15  ;;  %812 = vmatpush.msra.mxu1 %v123_v62 }
 0x4f9   :  { %v605_v20 = vmul.f32 %v1645_v18, %v593_v8  ;;  %vm611_vm7 = vweird.f32 %v1645_v18  ;;  %v1610_v8 = vpack.i.bf16 %v121_v63, %v123_v62 }
 0x4fa   :  { %v620_v21 = vadd.f32 %v619_v17, %v617_v19  ;;  %vm612_vm10 = vmor %vm610_vm9, %vm611_vm7  ;;  %813 = vmatpush.msra.mxu1 %v121_v63 }
 0x4fb   :  { %v606_v22 = vmul.f32 %v1645_v18, %v605_v20 }
 0x4fc   :  { %1533 = vmatmul.msk.f32.vlgmr.msra.gmra.mxu3 %vm149_vm0, %v620_v21 }
 0x4fd   :  { %v607_v23 = vmul.f32 0.5, %v606_v22 }
 0x4ff   :  { %v608_v24 = vsub.f32 1.5, %v607_v23 }
 0x501   :  { %v609_v25 = vmul.f32 %v1645_v18, %v608_v24  ;;  %v743_v24 = vperm.slane %v1960_v1, 7 }
 0x503   :  { %v613_v26 = vsel %vm612_vm10, %v1645_v18, %v609_v25 }
 0x504   :  { %v615_v27 = vmul.f32 %v613_v26, %v581_v55 }
 0x506   :  { %v618_v28 = vmul.f32 %v616_v12, %v615_v27 }
 0x508   :  { %v621_v29 = vadd.f32 %v619_v17, %v618_v28 }
 0x50a   :  { %1534 = vmatmul.msk.f32.gmra.mxu3 %vm149_vm0, %v621_v29 }
 0x57f   :  { %v651_v33 = vpop.f32.mrf.mxu3 }
 0x580   :  { %v652_v34 = vadd.f32 %v651_v33, %v627_v31 }
 0x582   :  { %v657_v36 = vmax.f32 %v652_v34, 0.0 }
 0x584   :  { %1535 = vmatmul.msk.f32.vlgmr.msrb.gmra.mxu2 %vm149_vm0, %v657_v36  ;;  %v2079_v36 = vld [vmem:[#allocation11 + $0x8] sm:$0xff] }
 0x585   :  { %v943_v39 = vperm.slane %v2079_v36, 2 }
 0x58d   :  { %v654_v42 = vpop.f32.mrf.mxu3 }
 0x58e   :  { %v655_v44 = vadd.f32 %v654_v42, %v627_v31  ;;  %v791_v42 = vperm.slane %v2079_v36, 1 }
 0x590   :  { %v658_v35 = vmax.f32 %v655_v44, 0.0 }
 0x592   :  { %1536 = vmatmul.msk.f32.gmra.mxu2 %vm149_vm0, %v658_v35 }
 0x607   :  { %v688_v46 = vpop.f32.mrf.mxu2 }
 0x608   :  { %v689_v43 = vadd.f32 %v688_v46, %v664_v45  ;;  %v785_v46 = vpop.f32.mrf.mxu0 }
 0x60a   :  { %v694_v47 = vadd.f32 %v689_v43, %v620_v21  ;;  %v740_v21 = vperm.slane %v1960_v1, 6 }
 0x60c   :  { %v696_v48 = vsel %vm149_vm0, %v694_v47, 0.0 }
 0x60d   :  { %697 = vadd.xlane.f32.xlu0 %v696_v48  ;;  %v1009_v48 = vld [vmem:[#allocation9 + $0xd8] sm:$0xff] }
 0x615   :  { %v691_v50 = vpop.f32.mrf.mxu2 }
 0x616   :  { %v692_v51 = vadd.f32 %v691_v50, %v664_v45 }
 0x618   :  { %v695_v52 = vadd.f32 %v692_v51, %v621_v29  ;;  %v1008_v51 = vld [vmem:[#allocation9 + $0xd0] sm:$0xff] }
 0x61a   :  { %v699_v54 = vsel %vm149_vm0, %v695_v52, 0.0 }
 0x61b   :  { %700 = vadd.xlane.f32.xlu2 %v699_v54  ;;  %v1006_v54 = vld [vmem:[#allocation9 + $0xc0] sm:$0xff] }
 0x680   :  { %v698_v2 = vpop.xlane.xlu0 %697 }
 0x681   :  { %v702_v55 = vmul.f32 %v698_v2, %v1936_v14  ;;  %v788_v2 = vpop.f32.mrf.mxu0 }
 0x683   :  { %v704_v56 = vsub.f32 %v694_v47, %v702_v55  ;;  %v761_v47 = vperm.slane %v2079_v36, 0 }
 0x685   :  { %v706_v57 = vmul.f32 %v704_v56, %v704_v56  ;;  %v786_v50 = vadd.f32 %v785_v46, %v761_v47  ;;  %v789_v55 = vadd.f32 %v788_v2, %v761_v47  ;;  %v753_v47 = vld [vmem:[#allocation9 + $0x88] sm:$0xff] }
 0x687   :  { %v708_v0 = vsel %vm149_vm0, %v706_v57, 0.0 }
 0x688   :  { %709 = vadd.xlane.f32.xlu1 %v708_v0 }
 0x68e   :  { %v701_v58 = vpop.xlane.xlu2 %700 }
 0x68f   :  { %v703_v6 = vmul.f32 %v701_v58, %v1936_v14 }
 0x691   :  { %v705_v9 = vsub.f32 %v695_v52, %v703_v6  ;;  %v1007_v52 = vld [vmem:[#allocation9 + $0xc8] sm:$0xff] }
 0x693   :  { %v707_v16 = vmul.f32 %v705_v9, %v705_v9 }
 0x695   :  { %v711_v59 = vsel %vm149_vm0, %v707_v16, 0.0 }
 0x696   :  { %712 = vadd.xlane.f32.xlu0 %v711_v59 }
 0x6a1   :  { %1611 = vrot.lane.b32.xlu1 %v1610_v8, %s1856_s4 }
 0x6fb   :  { %v710_v3 = vpop.xlane.xlu1 %709 }
 0x6fc   :  { %v714_v4 = vmul.f32 %v710_v3, %v1936_v14 }
 0x6fe   :  { %v716_v5 = vadd.f32 1e-05, %v714_v4 }
 0x700   :  { %1646 = vrsqrt.f32 %v716_v5  ;;  %vm724_vm12 = vweird.f32 %v716_v5 }
 0x706   :  { %v1647_v10 = vpop.eup %1646 }
 0x707   :  { %v719_v11 = vmul.f32 %v1647_v10, %v716_v5  ;;  %vm725_vm11 = vweird.f32 %v1647_v10 }
 0x708   :  { %vm726_vm13 = vmor %vm724_vm12, %vm725_vm11 }
 0x709   :  { %v720_v12 = vmul.f32 %v1647_v10, %v719_v11  ;;  %v713_v13 = vpop.xlane.xlu0 %712 }
 0x70a   :  { %v715_v15 = vmul.f32 %v713_v13, %v1936_v14 }
 0x70b   :  { %v721_v17 = vmul.f32 0.5, %v720_v12 }
 0x70c   :  { %v717_v18 = vadd.f32 1e-05, %v715_v15  ;;  %v755_v15 = vld [vmem:[#allocation9 + $0x98] sm:$0xff] }
 0x70d   :  { %v722_v19 = vsub.f32 1.5, %v721_v17  ;;  %v754_v17 = vld [vmem:[#allocation9 + $0x90] sm:$0xff]  ;;  %962 = vmatpush.msrb.mxu0 %v755_v15 }
 0x70e   :  { %1648 = vrsqrt.f32 %v717_v18  ;;  %vm734_vm15 = vweird.f32 %v717_v18 }
 0x70f   :  { %v723_v20 = vmul.f32 %v1647_v10, %v722_v19  ;;  %963 = vmatpush.msrb.mxu0 %v754_v17 }
 0x711   :  { %v727_v22 = vsel %vm726_vm13, %v1647_v10, %v723_v20  ;;  %964 = vmatpush.msrb.mxu0 %v753_v47  ;;  %v1013_v47 = vld [vmem:[#allocation9 + $0xf0] sm:$0xff] }
 0x712   :  { %v738_v23 = vmul.f32 %v727_v22, %v704_v56 }
 0x714   :  { %v1649_v25 = vpop.eup %1648  ;;  %v741_v26 = vmul.f32 %v740_v21, %v738_v23 }
 0x715   :  { %v729_v27 = vmul.f32 %v1649_v25, %v717_v18  ;;  %vm735_vm14 = vweird.f32 %v1649_v25 }
 0x716   :  { %v2071_v28 = vadd.f32 %v743_v24, %v741_v26  ;;  %vm736_vm1 = vmor %vm734_vm15, %vm735_vm14 }
 0x717   :  { %v730_v14 = vmul.f32 %v1649_v25, %v729_v27 }
 0x718   :  { %1539 = vmatmul.msk.f32.vlgmr.msra.gmra.mxu1 %vm149_vm0, %v2071_v28 }
 0x719   :  { %v731_v29 = vmul.f32 0.5, %v730_v14 }
 0x71b   :  { %v732_v49 = vsub.f32 1.5, %v731_v29 }
 0x71d   :  { %v733_v53 = vmul.f32 %v1649_v25, %v732_v49 }
 0x71f   :  { %v737_v30 = vsel %vm736_vm1, %v1649_v25, %v733_v53 }
 0x720   :  { %v739_v31 = vmul.f32 %v737_v30, %v705_v9 }
 0x722   :  { %v742_v33 = vmul.f32 %v740_v21, %v739_v31 }
 0x724   :  { %v2075_v34 = vadd.f32 %v743_v24, %v742_v33 }
 0x726   :  { %1540 = vmatmul.msk.f32.gmra.mxu1 %vm149_vm0, %v2075_v34 }
 0x795   :  { %v815_v1 = vpop.f32.mrf.mxu1 }
 0x796   :  { %v816_v35 = vadd.f32 %v815_v1, %v791_v42 }
 0x7a3   :  { %v818_v44 = vpop.f32.mrf.mxu1 }
 0x7a4   :  { %v819_v45 = vadd.f32 %v818_v44, %v791_v42 }
 0x7a6   :  { %v1600_v43 = vpack.i.bf16 %v816_v35, %v819_v45  ;;  %1541 = vmatpush.xpose.msk.msrb.mxu3 %vm149_vm0, %v819_v45 }
 0x7aa   :  { %1542 = vmatpush.xpose.msk.msrb.mxu3 %vm149_vm0, %v816_v35 }
 0x7ad   :  { %1543 = vmatmul.msk.f32.vlgmr.msrb.gmra.mxu3 %vm149_vm0, %v786_v50  ;;  %v760_v50 = vld [vmem:[#allocation9 + $0xb8] sm:$0xff] }
 0x7ae   :  { %1033 = vmatpush.msra.mxu3 %v1009_v48  ;;  %v752_v48 = vld [vmem:[#allocation9 + $0x80] sm:$0xff]  ;;  %994 = vmatpush.msrb.mxu1 %v760_v50 }
 0x7af   :  { %965 = vmatpush.msrb.mxu0 %v752_v48 }
 0x7b0   :  { %1034 = vmatpush.msra.mxu3 %v1008_v51 }
 0x7b2   :  { %1035 = vmatpush.msra.mxu3 %v1007_v52 }
 0x7b4   :  { %1036 = vmatpush.msra.mxu3 %v1006_v54 }
 0x7b5   :  { %1544 = vmatmul.msk.f32.gmra.mxu3 %vm149_vm0, %v789_v55  ;;  %v759_v55 = vld [vmem:[#allocation9 + $0xb0] sm:$0xff] }
 0x7b6   :  { %995 = vmatpush.msrb.mxu1 %v759_v55 }
 0x7bd   :  { %1551 = vmatmul.msk.f32.vlgmr.msra.gmra.mxu3 %vm149_vm0, %v2071_v28 }
 0x7c5   :  { %1552 = vmatmul.msk.f32.gmra.mxu3 %vm149_vm0, %v2075_v34 }
 0x830   :  { %v850_v56 = vpop.f32.mrf.mxu3 }
 0x831   :  { %v856_v57 = vmul.f32 0.17677669, %v850_v56  ;;  %v758_v56 = vld [vmem:[#allocation9 + $0xa8] sm:$0xff] }
 0x832   :  { %996 = vmatpush.msrb.mxu1 %v758_v56 }
 0x833   :  { %v858_v0 = vadd.f32 %v856_v57, %v2000_v32  ;;  %v757_v57 = vld [vmem:[#allocation9 + $0xa0] sm:$0xff] }
 0x834   :  { %997 = vmatpush.msrb.mxu1 %v757_v57 }
 0x835   :  { %v860_v58 = vsel %vm261_vm8, %v858_v0, -inf }
 0x836   :  { %861 = vmax.xlane.f32.xlu2 %v860_v58  ;;  %v1612_v58 = vpop.permute.xlu1 %1611 }
 0x837   :  { %v1613_v37 = vunpack.i.l.bf16 %v1612_v58 }
 0x838   :  { %v853_v6 = vpop.f32.mrf.mxu3 }
 0x839   :  { %v857_v9 = vmul.f32 0.17677669, %v853_v6 }
 0x83b   :  { %v859_v16 = vadd.f32 %v857_v9, %v2005_v41 }
 0x83d   :  { %v863_v59 = vsel %vm261_vm8, %v859_v16, -inf }
 0x83e   :  { %864 = vmax.xlane.f32.xlu0 %v863_v59 }
 0x8a9   :  { %v862_v62 = vpop.xlane.xlu2 %861 }
 0x8aa   :  { %v866_v63 = vsub.f32 %v858_v0, %v862_v62 }
 0x8ac   :  { %v868_v3 = vmul.f32 1.442695, %v866_v63 }
 0x8ae   :  { %1650 = vpow2.f32 %v868_v3 }
 0x8b1   :  { %v865_v4 = vpop.xlane.xlu0 %864 }
 0x8b2   :  { %v867_v5 = vsub.f32 %v859_v16, %v865_v4  ;;  %v975_v4 = vperm.slane %v2079_v36, 3 }
 0x8b4   :  { %v1651_v8 = vpop.eup %1650  ;;  %v870_v10 = vmul.f32 1.442695, %v867_v5 }
 0x8b5   :  { %v872_v11 = vsel %vm261_vm8, %v1651_v8, 0.0 }
 0x8b6   :  { %1652 = vpow2.f32 %v870_v10  ;;  %873 = vadd.xlane.f32.xlu2 %v872_v11 }
 0x8bc   :  { %v1653_v12 = vpop.eup %1652 }
 0x8bd   :  { %v875_v13 = vsel %vm261_vm8, %v1653_v12, 0.0 }
 0x8be   :  { %876 = vadd.xlane.f32.xlu0 %v875_v13  ;;  %v1044_v13 = vperm.slane %v2079_v36, 5 }
 0x8ce   :  { %1601 = vrot.lane.b32.xlu2 %v1600_v43, %s1857_s5 }
 0x8d2   :  { %1606 = vrot.lane.b32.xlu0 %v1605_v7, %s1856_s4 }
 0x929   :  { %v874_v18 = vpop.xlane.xlu2 %873 }
 0x92a   :  { %1654 = vrcp.f32 %v874_v18  ;;  %v889_v25 = vand.u32 2147483648, %v874_v18  ;;  %v887_v60 = vand.u32 2147483647, %v874_v18  ;;  %vm883_vm3 = vweird.f32 %v874_v18 }
 0x92c   :  { %v890_v14 = vor.u32 1.1754944e-38, %v889_v25  ;;  %vm888_vm5 = vcmp.eq.f32.partialorder %v887_v60, 8.507059e+37 }
 0x930   :  { %v1655_v19 = vpop.eup %1654 }
 0x931   :  { %v879_v20 = vmul.f32 %v1655_v19, %v874_v18  ;;  %v1602_v21 = vpop.permute.xlu2 %1601  ;;  %v877_v22 = vpop.xlane.xlu0 %876  ;;  %vm884_vm2 = vweird.f32 %v1655_v19 }
 0x932   :  { %v1603_v23 = vunpack.i.l.bf16 %v1602_v21  ;;  %1656 = vrcp.f32 %v877_v22  ;;  %v1604_v26 = vunpack.i.h.bf16 %v1602_v21  ;;  %vm885_vm4 = vmor %vm883_vm3, %vm884_vm2  ;;  %v904_v33 = vand.u32 2147483648, %v877_v22 }
 0x933   :  { %v880_v24 = vsub.f32 1.0, %v879_v20  ;;  %v902_v42 = vand.u32 2147483647, %v877_v22  ;;  %vm898_vm7 = vweird.f32 %v877_v22  ;;  %v1020_v21 = vperm.slane %v2079_v36, 4 }
 0x934   :  { %934 = vmatpush.msra.mxu2 %v1603_v23  ;;  %v905_v35 = vor.u32 1.1754944e-38, %v904_v33 }
 0x935   :  { %v881_v27 = vmul.f32 %v1655_v19, %v880_v24  ;;  %vm903_vm10 = vcmp.eq.f32.partialorder %v902_v42, 8.507059e+37 }
 0x936   :  { %935 = vmatpush.msra.mxu2 %v1604_v26 }
 0x937   :  { %v882_v61 = vadd.f32 %v1655_v19, %v881_v27 }
 0x938   :  { %v1657_v7 = vpop.eup %1656 }
 0x939   :  { %v886_v29 = vsel %vm885_vm4, %v1655_v19, %v882_v61  ;;  %v894_v49 = vmul.f32 %v1657_v7, %v877_v22  ;;  %vm899_vm6 = vweird.f32 %v1657_v7  ;;  %v1038_v19 = vpop.f32.mrf.mxu3  ;;  %vm1290_vm4 = vcmask 778752  }
 0x93a   :  { %v891_v53 = vsel %vm888_vm5, %v890_v14, %v886_v29  ;;  %vm900_vm9 = vmor %vm898_vm7, %vm899_vm6  ;;  %v1039_v22 = vadd.f32 %v1038_v19, %v1020_v21  ;;  %v1017_v19 = vld [vmem:[#allocation9 + $0x108] sm:$0xff]  ;;  %vm1300_vm5 = vcmask 1041152   ;;  %vm1491_vm6 = vcmask 9216  }
 0x93b   :  { %v895_v30 = vsub.f32 1.0, %v894_v49  ;;  %v892_v31 = vmul.f32 %v1651_v8, %v891_v53 }
 0x93d   :  { %v896_v1 = vmul.f32 %v1657_v7, %v895_v30  ;;  %1545 = vmatmul.msk.f32.vlgmr.msra.gmra.mxu2 %vm261_vm8, %v892_v31 }
 0x93f   :  { %v897_v44 = vadd.f32 %v1657_v7, %v896_v1 }
 0x941   :  { %v901_v45 = vsel %vm900_vm9, %v1657_v7, %v897_v44  ;;  %v1041_v23 = vpop.f32.mrf.mxu3 }
 0x942   :  { %v906_v46 = vsel %vm903_vm10, %v905_v35, %v901_v45  ;;  %v1042_v24 = vadd.f32 %v1041_v23, %v1020_v21  ;;  %v1212_v21 = vperm.slane %v2079_v36, 6 }
 0x943   :  { %v907_v43 = vmul.f32 %v1653_v12, %v906_v46 }
 0x944   :  { %v1607_v0 = vpop.permute.xlu0 %1606 }
 0x945   :  { %1546 = vmatmul.msk.f32.gmra.mxu2 %vm261_vm8, %v907_v43  ;;  %v1609_v6 = vunpack.i.h.bf16 %v1607_v0  ;;  %v1608_v9 = vunpack.i.l.bf16 %v1607_v0  ;;  %v1014_v43 = vld [vmem:[#allocation9 + $0xf8] sm:$0xff] }
 0x946   :  { %1231 = vmatpush.msrb.mxu3 %v1014_v43 }
 0x947   :  { %1079 = vmatpush.msrb.mxu2 %v1608_v9 }
 0x948   :  { %1232 = vmatpush.msrb.mxu3 %v1013_v47 }
 0x949   :  { %1080 = vmatpush.msrb.mxu2 %v1609_v6 }
 0x94b   :  { %1081 = vmatpush.msrb.mxu2 %v1613_v37 }
 0x9c0   :  { %v937_v51 = vpop.f32.mrf.mxu2 }
 0x9c1   :  { %v938_v52 = vadd.f32 %v937_v51, %v442_v38  ;;  %v1614_v38 = vunpack.i.h.bf16 %v1612_v58 }
 0x9c3   :  { %1547 = vmatmul.msk.f32.vlgmr.msrb.gmra.mxu0 %vm149_vm0, %v938_v52  ;;  %1082 = vmatpush.msrb.mxu2 %v1614_v38 }
 0x9c8   :  { %v940_v54 = vpop.f32.mrf.mxu2 }
 0x9c9   :  { %v941_v2 = vadd.f32 %v940_v54, %v443_v40 }
 0x9cb   :  { %1548 = vmatmul.msk.f32.gmra.mxu0 %vm149_vm0, %v941_v2 }
 0xa40   :  { %v967_v40 = vpop.f32.mrf.mxu0 }
 0xa41   :  { %v968_v16 = vadd.f32 %v967_v40, %v943_v39 }
 0xa43   :  { %v973_v59 = vmax.f32 %v968_v16, 0.0 }
 0xa45   :  { %1549 = vmatmul.msk.f32.vlgmr.msrb.gmra.mxu1 %vm149_vm0, %v973_v59 }
 0xa48   :  { %v970_v62 = vpop.f32.mrf.mxu0 }
 0xa49   :  { %v971_v63 = vadd.f32 %v970_v62, %v943_v39 }
 0xa4b   :  { %v974_v3 = vmax.f32 %v971_v63, 0.0 }
 0xa4d   :  { %1550 = vmatmul.msk.f32.gmra.mxu1 %vm149_vm0, %v974_v3 }
 0xac2   :  { %v999_v5 = vpop.f32.mrf.mxu1 }
 0xac3   :  { %v1000_v8 = vadd.f32 %v999_v5, %v975_v4 }
 0xac5   :  { %1553 = vmatmul.msk.f32.vlgmr.msrb.gmra.mxu2 %vm149_vm0, %v1000_v8  ;;  %v1012_v8 = vld [vmem:[#allocation9 + $0xe8] sm:$0xff] }
 0xac6   :  { %1233 = vmatpush.msrb.mxu3 %v1012_v8  ;;  %v1395_v8 = vld [vmem:[#allocation12 + $0x40] sm:$0xff] }
 0xaca   :  { %v1002_v10 = vpop.f32.mrf.mxu1 }
 0xacb   :  { %v1003_v11 = vadd.f32 %v1002_v10, %v975_v4  ;;  %v1011_v10 = vld [vmem:[#allocation9 + $0xe0] sm:$0xff] }
 0xacc   :  { %1234 = vmatpush.msrb.mxu3 %v1011_v10  ;;  %v1411_v10 = vld [vmem:[#allocation12 + $0xc0] sm:$0xff] }
 0xacd   :  { %1554 = vmatmul.msk.f32.gmra.mxu2 %vm149_vm0, %v1003_v11  ;;  %v1019_v11 = vld [vmem:[#allocation9 + $0x118] sm:$0xff] }
 0xace   :  { %1263 = vmatpush.msra.mxu2 %v1019_v11  ;;  %v1394_v11 = vld [vmem:[#allocation12 + $0x38] sm:$0xff] }
 0xb48   :  { %v1084_v12 = vpop.f32.mrf.mxu2 }
 0xb49   :  { %v1085_v17 = vadd.f32 %v1084_v12, %v1044_v13 }
 0xb50   :  { %v1087_v15 = vpop.f32.mrf.mxu2 }
 0xb51   :  { %v1088_v18 = vadd.f32 %v1087_v15, %v1044_v13 }
 0xb53   :  { %v1615_v20 = vpack.i.bf16 %v1085_v17, %v1088_v18  ;;  %1555 = vmatpush.xpose.msk.msra.mxu0 %vm149_vm0, %v1088_v18  ;;  %v1018_v18 = vld [vmem:[#allocation9 + $0x110] sm:$0xff] }
 0xb54   :  { %1264 = vmatpush.msra.mxu2 %v1018_v18  ;;  %v1408_v18 = vld [vmem:[#allocation12 + $0xa8] sm:$0xff] }
 0xb56   :  { %1265 = vmatpush.msra.mxu2 %v1017_v19  ;;  %v1391_v19 = vld [vmem:[#allocation12 + $0x20] sm:$0xff] }
 0xb57   :  { %1556 = vmatpush.xpose.msk.msra.mxu0 %vm149_vm0, %v1085_v17 }
 0xb5a   :  { %1557 = vmatmul.msk.f32.vlgmr.msra.gmra.mxu0 %vm149_vm0, %v1039_v22 }
 0xb62   :  { %1558 = vmatmul.msk.f32.gmra.mxu0 %vm149_vm0, %v1042_v24 }
 0xbd7   :  { %v1119_v25 = vpop.f32.mrf.mxu0 }
 0xbd8   :  { %v1125_v26 = vmul.f32 0.17677669, %v1119_v25 }
 0xbda   :  { %v1127_v27 = vadd.f32 %v1125_v26, %v2000_v32 }
 0xbdc   :  { %v1129_v60 = vsel %vm261_vm8, %v1127_v27, -inf }
 0xbdd   :  { %1130 = vmax.xlane.f32.xlu2 %v1129_v60 }
 0xbdf   :  { %v1122_v61 = vpop.f32.mrf.mxu0 }
 0xbe0   :  { %v1126_v7 = vmul.f32 0.17677669, %v1122_v61 }
 0xbe2   :  { %v1128_v14 = vadd.f32 %v1126_v7, %v2005_v41 }
 0xbe4   :  { %v1132_v29 = vsel %vm261_vm8, %v1128_v14, -inf }
 0xbe5   :  { %1133 = vmax.xlane.f32.xlu0 %v1132_v29 }
 0xbf5   :  { %1616 = vrot.lane.b32.xlu2 %v1615_v20, %s1857_s5  ;;  %v1016_v20 = vld [vmem:[#allocation9 + $0x100] sm:$0xff] }
 0xbf6   :  { %1266 = vmatpush.msra.mxu2 %v1016_v20  ;;  %v1407_v20 = vld [vmem:[#allocation12 + $0xa0] sm:$0xff] }
 0xc50   :  { %v1131_v49 = vpop.xlane.xlu2 %1130 }
 0xc51   :  { %v1135_v53 = vsub.f32 %v1127_v27, %v1131_v49 }
 0xc53   :  { %v1137_v30 = vmul.f32 1.442695, %v1135_v53 }
 0xc55   :  { %1658 = vpow2.f32 %v1137_v30 }
 0xc58   :  { %v1617_v31 = vpop.permute.xlu2 %1616  ;;  %v1134_v33 = vpop.xlane.xlu0 %1133 }
 0xc59   :  { %v1618_v1 = vunpack.i.l.bf16 %v1617_v31  ;;  %v1136_v32 = vsub.f32 %v1128_v14, %v1134_v33  ;;  %v1619_v44 = vunpack.i.h.bf16 %v1617_v31 }
 0xc5b   :  { %v1659_v42 = vpop.eup %1658  ;;  %v1139_v35 = vmul.f32 1.442695, %v1136_v32  ;;  %1203 = vmatpush.msra.mxu1 %v1618_v1 }
 0xc5c   :  { %v1141_v45 = vsel %vm261_vm8, %v1659_v42, 0.0 }
 0xc5d   :  { %1660 = vpow2.f32 %v1139_v35  ;;  %1142 = vadd.xlane.f32.xlu1 %v1141_v45  ;;  %1204 = vmatpush.msra.mxu1 %v1619_v44 }
 0xc63   :  { %v1661_v41 = vpop.eup %1660 }
 0xc64   :  { %v1144_v46 = vsel %vm261_vm8, %v1661_v41, 0.0 }
 0xc65   :  { %1145 = vadd.xlane.f32.xlu0 %v1144_v46 }
 0xcd0   :  { %v1143_v48 = vpop.xlane.xlu1 %1142 }
 0xcd1   :  { %1662 = vrcp.f32 %v1143_v48  ;;  %v1158_v2 = vand.u32 2147483648, %v1143_v48  ;;  %v1156_v56 = vand.u32 2147483647, %v1143_v48  ;;  %vm1152_vm12 = vweird.f32 %v1143_v48 }
 0xcd3   :  { %v1159_v58 = vor.u32 1.1754944e-38, %v1158_v2  ;;  %vm1157_vm14 = vcmp.eq.f32.partialorder %v1156_v56, 8.507059e+37 }
 0xcd7   :  { %v1663_v50 = vpop.eup %1662 }
 0xcd8   :  { %v1148_v51 = vmul.f32 %v1663_v50, %v1143_v48  ;;  %v1146_v52 = vpop.xlane.xlu0 %1145  ;;  %vm1153_vm11 = vweird.f32 %v1663_v50 }
 0xcd9   :  { %1664 = vrcp.f32 %v1146_v52  ;;  %vm1154_vm13 = vmor %vm1152_vm12, %vm1153_vm11  ;;  %v1173_v40 = vand.u32 2147483648, %v1146_v52  ;;  %v1171_v59 = vand.u32 2147483647, %v1146_v52  ;;  %vm1167_vm1 = vweird.f32 %v1146_v52 }
 0xcda   :  { %v1149_v54 = vsub.f32 1.0, %v1148_v51 }
 0xcdb   :  { %v1174_v63 = vor.u32 1.1754944e-38, %v1173_v40  ;;  %vm1172_vm3 = vcmp.eq.f32.partialorder %v1171_v59, 8.507059e+37  ;;  %v1399_v40 = vld [vmem:[#allocation12 + $0x60] sm:$0xff]  ;;  %v1398_v59 = vld [vmem:[#allocation12 + $0x58] sm:$0xff] }
 0xcdc   :  { %v1150_v55 = vmul.f32 %v1663_v50, %v1149_v54 }
 0xcde   :  { %v1151_v57 = vadd.f32 %v1663_v50, %v1150_v55 }
 0xcdf   :  { %v1665_v0 = vpop.eup %1664 }
 0xce0   :  { %v1155_v6 = vsel %vm1154_vm13, %v1663_v50, %v1151_v57  ;;  %v1163_v9 = vmul.f32 %v1665_v0, %v1146_v52  ;;  %vm1168_vm15 = vweird.f32 %v1665_v0 }
 0xce1   :  { %v1160_v37 = vsel %vm1157_vm14, %v1159_v58, %v1155_v6  ;;  %vm1169_vm2 = vmor %vm1167_vm1, %vm1168_vm15  ;;  %v1402_v58 = vld [vmem:[#allocation12 + $0x78] sm:$0xff] }
 0xce2   :  { %v1164_v38 = vsub.f32 1.0, %v1163_v9  ;;  %v1161_v39 = vmul.f32 %v1659_v42, %v1160_v37  ;;  %v1418_v6 = vld [vmem:[#allocation12 + $0xf8] sm:$0xff]  ;;  %v1401_v9 = vld [vmem:[#allocation12 + $0x70] sm:$0xff]  ;;  %1426 = vmatpush.msrb.mxu0 %v1402_v58 }
 0xce3   :  { %1446 = vmatpush.msrb.mxu1 %v1418_v6  ;;  %v1417_v37 = vld [vmem:[#allocation12 + $0xf0] sm:$0xff] }
 0xce4   :  { %v1165_v16 = vmul.f32 %v1665_v0, %v1164_v38  ;;  %1559 = vmatmul.msk.f32.vlgmr.msra.gmra.mxu1 %vm261_vm8, %v1161_v39  ;;  %v1400_v38 = vld [vmem:[#allocation12 + $0x68] sm:$0xff]  ;;  %1427 = vmatpush.msrb.mxu0 %v1401_v9 }
 0xce5   :  { %v1416_v39 = vld [vmem:[#allocation12 + $0xe8] sm:$0xff]  ;;  %1447 = vmatpush.msrb.mxu1 %v1417_v37 }
 0xce6   :  { %v1166_v62 = vadd.f32 %v1665_v0, %v1165_v16  ;;  %v1415_v16 = vld [vmem:[#allocation12 + $0xe0] sm:$0xff]  ;;  %1428 = vmatpush.msrb.mxu0 %v1400_v38 }
 0xce7   :  { %1448 = vmatpush.msrb.mxu1 %v1416_v39 }
 0xce8   :  { %v1170_v3 = vsel %vm1169_vm2, %v1665_v0, %v1166_v62  ;;  %1429 = vmatpush.msrb.mxu0 %v1399_v40  ;;  %v1414_v62 = vld [vmem:[#allocation12 + $0xd8] sm:$0xff] }
 0xce9   :  { %v1175_v4 = vsel %vm1172_vm3, %v1174_v63, %v1170_v3  ;;  %1449 = vmatpush.msrb.mxu1 %v1415_v16  ;;  %v1397_v63 = vld [vmem:[#allocation12 + $0x50] sm:$0xff] }
 0xcea   :  { %v1176_v5 = vmul.f32 %v1661_v41, %v1175_v4  ;;  %1430 = vmatpush.msrb.mxu0 %v1398_v59  ;;  %v1413_v3 = vld [vmem:[#allocation12 + $0xd0] sm:$0xff]  ;;  %v1396_v4 = vld [vmem:[#allocation12 + $0x48] sm:$0xff] }
 0xceb   :  { %1450 = vmatpush.msrb.mxu1 %v1414_v62 }
 0xcec   :  { %1560 = vmatmul.msk.f32.gmra.mxu1 %vm261_vm8, %v1176_v5  ;;  %vm1274_vm8 = vcmask 253952   ;;  %v1412_v5 = vld [vmem:[#allocation12 + $0xc8] sm:$0xff]  ;;  %1431 = vmatpush.msrb.mxu0 %v1397_v63 }
 0xced   :  { %1451 = vmatpush.msrb.mxu1 %v1413_v3 }
 0xcee   :  { %1432 = vmatpush.msrb.mxu0 %v1396_v4 }
 0xcef   :  { %1452 = vmatpush.msrb.mxu1 %v1412_v5 }
 0xcf0   :  { %1433 = vmatpush.msrb.mxu0 %v1395_v8 }
 0xcf1   :  { %1453 = vmatpush.msrb.mxu1 %v1411_v10 }
 0xcf2   :  { %1434 = vmatpush.msrb.mxu0 %v1394_v11 }
 0xd61   :  { %v1206_v12 = vpop.f32.mrf.mxu1 }
 0xd62   :  { %v1207_v13 = vadd.f32 %v1206_v12, %v2071_v28  ;;  %v1410_v12 = vld [vmem:[#allocation12 + $0xb8] sm:$0xff] }
 0xd63   :  { %1454 = vmatpush.msrb.mxu1 %v1410_v12 }
 0xd64   :  { %1561 = vmatmul.msk.f32.vlgmr.msrb.gmra.mxu3 %vm149_vm0, %v1207_v13  ;;  %v1393_v13 = vld [vmem:[#allocation12 + $0x30] sm:$0xff] }
 0xd65   :  { %1435 = vmatpush.msrb.mxu0 %v1393_v13 }
 0xd69   :  { %v1209_v15 = vpop.f32.mrf.mxu1 }
 0xd6a   :  { %v1210_v17 = vadd.f32 %v1209_v15, %v2075_v34  ;;  %v1244_v34 = vperm.slane %v2079_v36, 7  ;;  %v1409_v15 = vld [vmem:[#allocation12 + $0xb0] sm:$0xff] }
 0xd6b   :  { %1455 = vmatpush.msrb.mxu1 %v1409_v15 }
 0xd6c   :  { %1562 = vmatmul.msk.f32.gmra.mxu3 %vm149_vm0, %v1210_v17  ;;  %v1392_v17 = vld [vmem:[#allocation12 + $0x28] sm:$0xff] }
 0xd6d   :  { %1436 = vmatpush.msrb.mxu0 %v1392_v17  ;;  %1456 = vmatpush.msrb.mxu1 %v1408_v18 }
 0xd6f   :  { %1437 = vmatpush.msrb.mxu0 %v1391_v19  ;;  %1457 = vmatpush.msrb.mxu1 %v1407_v20 }
 0xde7   :  { %v1236_v22 = vpop.f32.mrf.mxu3 }
 0xde8   :  { %v1237_v23 = vadd.f32 %v1236_v22, %v1212_v21  ;;  %v1406_v22 = vld [vmem:[#allocation12 + $0x98] sm:$0xff] }
 0xde9   :  { %1458 = vmatpush.msrb.mxu1 %v1406_v22 }
 0xdea   :  { %v1242_v24 = vmax.f32 %v1237_v23, 0.0  ;;  %v1389_v23 = vld [vmem:[#allocation12 + $0x10] sm:$0xff] }
 0xdec   :  { %1563 = vmatmul.msk.f32.vlgmr.msra.gmra.mxu2 %vm149_vm0, %v1242_v24  ;;  %v1405_v24 = vld [vmem:[#allocation12 + $0x90] sm:$0xff] }
 0xded   :  { %1459 = vmatpush.msrb.mxu1 %v1405_v24 }
 0xdef   :  { %v1239_v28 = vpop.f32.mrf.mxu3 }
 0xdf0   :  { %v1240_v25 = vadd.f32 %v1239_v28, %v1212_v21  ;;  %v1390_v21 = vld [vmem:[#allocation12 + $0x18] sm:$0xff]  ;;  %v1388_v28 = vld [vmem:[#allocation12 + $0x8] sm:$0xff] }
 0xdf1   :  { %1438 = vmatpush.msrb.mxu0 %v1390_v21 }
 0xdf2   :  { %v1243_v26 = vmax.f32 %v1240_v25, 0.0  ;;  %v1404_v25 = vld [vmem:[#allocation12 + $0x88] sm:$0xff] }
 0xdf3   :  { %1439 = vmatpush.msrb.mxu0 %v1389_v23  ;;  %1460 = vmatpush.msrb.mxu1 %v1404_v25 }
 0xdf4   :  { %1564 = vmatmul.msk.f32.gmra.mxu2 %vm149_vm0, %v1243_v26  ;;  %vm1282_vm0 = vcmask 516352   ;;  %v1387_v26 = vld [vmem:[#allocation12] sm:$0xff] }
 0xdf5   :  { %1440 = vmatpush.msrb.mxu0 %v1388_v28 }
 0xdf7   :  { %1441 = vmatpush.msrb.mxu0 %v1387_v26 }
 0xe6f   :  { %v1268_v27 = vpop.f32.mrf.mxu2 }
 0xe70   :  { %v1269_v60 = vadd.f32 %v1268_v27, %v1244_v34 }
 0xe72   :  { %1284 = vst.sshfl [vmem:[#allocation1] sm:$0xff pattern:$0x73625140] %v1269_v60  ;;  %v1565_v61 = vrot.slane %v1269_v60, 9 }
 0xe73   :  { %1275 = vst.msk [vmem:[#allocation2] sm:$0x1] %vm1274_vm8, %v1269_v60 }
 0xe74   :  { %1279 = vrot.lane.b32.xlu0 %v1565_v61, %s1858_s27 }
 0xe77   :  { %v1271_v7 = vpop.f32.mrf.mxu2 }
 0xe78   :  { %v1272_v14 = vadd.f32 %v1271_v7, %v1244_v34  ;;  %v1403_v34 = vld [vmem:[#allocation12 + $0x80] sm:$0xff] }
 0xe79   :  { %v1286_v29 = vld [vmem:[#allocation1 + $0x1] ss:$4 sm:$0xff]  ;;  %1461 = vmatpush.msrb.mxu1 %v1403_v34 }
 0xe7a   :  { %1292 = vst.sshfl [vmem:[#allocation1] sm:$0xff pattern:$0x73625140] %v1269_v60  ;;  %1287 = vrot.lane.b32.xlu2 %v1286_v29, %s1856_s4  ;;  %v1569_v49 = vrot.slane %v1272_v14, 9 }
 0xe7b   :  { %1332 = vst.msk [vmem:[#allocation2 + $0x1] sm:$0x1] %vm1274_vm8, %v1272_v14 }
 0xe81   :  { %v1294_v53 = vld [vmem:[#allocation1 + $0x1] ss:$4 sm:$0xff] }
 0xe82   :  { %1302 = vst.sshfl [vmem:[#allocation1] sm:$0xff pattern:$0x73625140] %v1269_v60  ;;  %1336 = vrot.lane.b32.xlu2 %v1569_v49, %s1858_s27  ;;  %v1566_v36 = vrot.slane %v1294_v53, 9  ;;  %v130_v53 = vld [vmem:[#allocation11 + $0x10] sm:$0xf] }
 0xe84   :  { %1297 = vrot.lane.b32.xlu1 %v1566_v36, %s1857_s5  ;;  %v1469_v36 = vrot.slane %v130_v53, 2 }
 0xe86   :  { %1486 = vmatpush.xpose.msra.mxu3 %v1469_v36 }
 0xe89   :  { %v1304_v30 = vld [vmem:[#allocation1 + $0x2] ss:$4 sm:$0xff] }
 0xe8a   :  { %1307 = vst.sshfl [vmem:[#allocation1] sm:$0xff pattern:$0x73625140] %v1269_v60 }
 0xe8b   :  { %1306 = vst.msk [vmem:[#allocation2 + $0x2] sm:$0x1] %vm1274_vm8, %v1304_v30  ;;  %v1419_v30 = vperm.slane %v130_v53, 0 }
 0xe91   :  { %v1309_v31 = vld [vmem:[#allocation1 + $0x2] ss:$4 sm:$0xff] }
 0xe92   :  { %v1567_v33 = vrot.slane %v1309_v31, 9  ;;  %1316 = vst.sshfl [vmem:[#allocation1] sm:$0xff pattern:$0x73625140] %v1269_v60 }
 0xe94   :  { %1312 = vrot.lane.b32.xlu1 %v1567_v33, %s1858_s27 }
 0xe99   :  { %v1318_v1 = vld [vmem:[#allocation1 + $0x3] ss:$4 sm:$0xff] }
 0xe9a   :  { %1323 = vst.sshfl [vmem:[#allocation1] sm:$0xff pattern:$0x73625140] %v1269_v60  ;;  %1319 = vrot.lane.b32.xlu0 %v1318_v1, %s1856_s4 }
 0xea1   :  { %v1325_v32 = vld [vmem:[#allocation1 + $0x3] ss:$4 sm:$0xff] }
 0xea2   :  { %1340 = vst.sshfl [vmem:[#allocation1] sm:$0xff pattern:$0x73625140] %v1272_v14  ;;  %v1568_v44 = vrot.slane %v1325_v32, 9 }
 0xea9   :  { %v1342_v42 = vld [vmem:[#allocation1 + $0x1] ss:$4 sm:$0xff] }
 0xeaa   :  { %1347 = vst.sshfl [vmem:[#allocation1] sm:$0xff pattern:$0x73625140] %v1272_v14  ;;  %1343 = vrot.lane.b32.xlu2 %v1342_v42, %s1856_s4 }
 0xeb1   :  { %v1349_v35 = vld [vmem:[#allocation1 + $0x1] ss:$4 sm:$0xff] }
 0xeb2   :  { %1356 = vst.sshfl [vmem:[#allocation1] sm:$0xff pattern:$0x73625140] %v1272_v14  ;;  %1328 = vrot.lane.b32.xlu2 %v1568_v44, %s1857_s5  ;;  %v1570_v50 = vrot.slane %v1349_v35, 9  ;;  %v1467_v44 = vperm.slane %v130_v53, 1 }
 0xeb9   :  { %v1358_v45 = vld [vmem:[#allocation1 + $0x2] ss:$4 sm:$0xff] }
 0xeba   :  { %1361 = vst.sshfl [vmem:[#allocation1] sm:$0xff pattern:$0x73625140] %v1272_v14 }
 0xebb   :  { %1360 = vst.msk [vmem:[#allocation2 + $0x3] sm:$0x1] %vm1274_vm8, %v1358_v45 }
 0xec1   :  { %v1363_v41 = vld [vmem:[#allocation1 + $0x2] ss:$4 sm:$0xff] }
 0xec2   :  { %v1571_v46 = vrot.slane %v1363_v41, 9  ;;  %1370 = vst.sshfl [vmem:[#allocation1] sm:$0xff pattern:$0x73625140] %v1272_v14 }
 0xec4   :  { %1366 = vrot.lane.b32.xlu0 %v1571_v46, %s1858_s27 }
 0xec9   :  { %v1372_v43 = vld [vmem:[#allocation1 + $0x3] ss:$4 sm:$0xff] }
 0xeca   :  { %1377 = vst.sshfl [vmem:[#allocation1] sm:$0xff pattern:$0x73625140] %v1272_v14 }
 0xecc   :  { %1373 = vrot.lane.b32.xlu0 %v1372_v43, %s1856_s4 }
 0xed1   :  { %v1379_v47 = vld [vmem:[#allocation1 + $0x3] ss:$4 sm:$0xff] }
 0xed2   :  { %v1572_v48 = vrot.slane %v1379_v47, 9 }
 0xed4   :  { %v1288_v51 = vpop.permute.xlu2 %1287  ;;  %1382 = vrot.lane.b32.xlu1 %v1572_v48, %s1857_s5  ;;  %1352 = vrot.lane.b32.xlu0 %v1570_v50, %s1857_s5 }
 0xedc   :  { %v1337_v52 = vpop.permute.xlu2 %1336 }
 0xedd   :  { %1339 = vst.msk [vmem:[#allocation2 + $0x1] sm:$0x1] %vm1282_vm0, %v1337_v52 }
 0xee6   :  { %v1280_v54 = vpop.permute.xlu0 %1279 }
 0xee7   :  { %1283 = vst.msk [vmem:[#allocation2] sm:$0x1] %vm1282_vm0, %v1280_v54 }
 0xee8   :  { %1291 = vst.msk [vmem:[#allocation2] sm:$0x1] %vm1290_vm4, %v1288_v51 }
 0xef6   :  { %v1298_v2 = vpop.permute.xlu1 %1297 }
 0xef7   :  { %1301 = vst.msk [vmem:[#allocation2] sm:$0x1] %vm1300_vm5, %v1298_v2 }
 0xf04   :  { %v1344_v55 = vpop.permute.xlu2 %1343 }
 0xf05   :  { %1346 = vst.msk [vmem:[#allocation2 + $0x1] sm:$0x1] %vm1290_vm4, %v1344_v55 }
 0xf06   :  { %v1313_v56 = vpop.permute.xlu1 %1312 }
 0xf07   :  { %1315 = vst.msk [vmem:[#allocation2 + $0x2] sm:$0x1] %vm1282_vm0, %v1313_v56 }
 0xf0c   :  { %v1329_v57 = vpop.permute.xlu2 %1328  ;;  %v1320_v0 = vpop.permute.xlu0 %1319 }
 0xf0d   :  { %1322 = vst.msk [vmem:[#allocation2 + $0x2] sm:$0x1] %vm1290_vm4, %v1320_v0 }
 0xf0e   :  { %1331 = vst.msk [vmem:[#allocation2 + $0x2] sm:$0x1] %vm1300_vm5, %v1329_v57 }
 0xf36   :  { %v1367_v27 = vpop.permute.xlu0 %1366 }
 0xf37   :  { %1369 = vst.msk [vmem:[#allocation2 + $0x3] sm:$0x1] %vm1282_vm0, %v1367_v27 }
 0xf3e   :  { %v1374_v60 = vpop.permute.xlu0 %1373 }
 0xf3f   :  { %1376 = vst.msk [vmem:[#allocation2 + $0x3] sm:$0x1] %vm1290_vm4, %v1374_v60 }
 0xf46   :  { %v1383_v61 = vpop.permute.xlu1 %1382  ;;  %v1353_v7 = vpop.permute.xlu0 %1352 }
 0xf47   :  { %1385 = vst.msk [vmem:[#allocation2 + $0x3] sm:$0x1] %vm1300_vm5, %v1383_v61 }
 0xf48   :  { %1355 = vst.msk [vmem:[#allocation2 + $0x1] sm:$0x1] %vm1300_vm5, %v1353_v7 }
 0xf4f   :  { %v1386_v14 = vld [vmem:[#allocation2] sm:$0xf] }
 0xf50   :  { %1421 = vst [vmem:[#allocation1] ss:$4 sm:$0xff] %v1386_v14 }
 0xf57   :  { %v1422_v29 = vld.sshfl [vmem:[#allocation1] sm:$0xff pattern:$0x73625140]  ;;  %v1423_v49 = vld.sshfl [vmem:[#allocation1 + $0x8] sm:$0xff pattern:$0x73625140] }
 0xf58   :  { %1442 = vmatmul.f32.vlgmr.msrb.gmra.mxu0 %v1422_v29  ;;  %1462 = vmatmul.f32.vlgmr.msrb.gmra.mxu1 %v1423_v49 }
 0xfd5   :  { %v1443_v31 = vpop.f32.mrf.mxu0  ;;  %v1463_v1 = vpop.f32.mrf.mxu1 }
 0xfd6   :  { %v1444_v33 = vadd.f32 %v1443_v31, %v1419_v30 }
 0xfd8   :  { %v1464_v32 = vadd.f32 %v1463_v1, %v1444_v33 }
 0xfda   :  { %v1466_v42 = vmax.f32 %v1464_v32, 0.0 }
 0xfdc   :  { %1487 = vmatmul.f32.vlgmr.msra.gmra.mxu3 %v1466_v42 }
0x105f   :  { %v1488_v35 = vpop.f32.mrf.mxu3 }
0x1060   :  { %v1489_v45 = vadd.f32 %v1488_v35, %v1467_v44 }
0x1062   :  { %1492 = vst.msk [vmem:[#allocation14] sm:$0x3] %vm1491_vm6, %v1489_v45 }
0x1063   :  { %1503 = dma.vmem_to_hbm [thread:$0]  %s1499_s29, 32, %s1501_s8, [#allocation5]  }
0x1064   :  { %1842 = dma.done.wait [#allocation5], 32  }
0x1065   :  { %1843 = vsyncadd [#allocation5], 4294967264 }
0x1066   :  { %1508 = vsyncpa [#allocation4], 1 }
0x1067   :  { %1509 = vsyncpa [#allocation7], 1 }
0x1068   :  { %1510 = vsyncpa [#allocation10], 1 }
0x1069   :  { %1511 = vsyncpa [#allocation13], 1 }
0x106a   :  { %1512 = vsyncpa [#allocation5], 1 }

</bundles_post_ra>
